<compile_context>
chip_gen: v6e
topology: v6e:2x2x1
jax: 0.10.0
libtpu: 0.0.40
codegen_flags: <defaults>
</compile_context>

<pallas_src>
import functools

import jax
import jax.numpy as jnp
from jax import lax
from jax.experimental import pallas as pl
from jax.experimental.pallas import tpu as pltpu

NEG_SLOPE = 0.2
BN_EPS = 1e-5
ACT_DTYPE = jnp.bfloat16        # activation / MXU-operand dtype
_VMEM_BUDGET = 20 << 20         # soft cap for streamed (double-buffered) blocks


# ---------------------------------------------------------------------------
# Pallas kernels
# ---------------------------------------------------------------------------

def _conv_bias_act_kernel(p_ref, w_ref, b_ref, o_ref, *, neg_slope):
    """One M-tile of: patches @ W + b, then LeakyReLU. bf16 in, f32 acc, bf16 out."""
    acc = jnp.dot(p_ref[...], w_ref[...], preferred_element_type=jnp.float32)
    acc = acc + b_ref[...]
    o_ref[...] = jnp.where(acc >= 0.0, acc, neg_slope * acc).astype(o_ref.dtype)


def _conv_stats_kernel(p_ref, w_ref, y_ref, sum_ref, sq_ref):
    """One M-tile of: y = patches @ W (no bias). Writes y (bf16) and accumulates
    the per-channel f32 sum / sum-of-squares needed for training-mode BatchNorm
    into resident (1, C) output blocks."""
    y = jnp.dot(p_ref[...], w_ref[...], preferred_element_type=jnp.float32)
    y_ref[...] = y.astype(y_ref.dtype)

    @pl.when(pl.program_id(0) == 0)
    def _init():
        sum_ref[...] = jnp.zeros_like(sum_ref)
        sq_ref[...] = jnp.zeros_like(sq_ref)

    sum_ref[...] += jnp.sum(y, axis=0, keepdims=True)
    sq_ref[...] += jnp.sum(y * y, axis=0, keepdims=True)


def _bn_act_kernel(y_ref, scale_ref, shift_ref, o_ref, *, neg_slope):
    """One M-tile of: y * scale + shift (folded BatchNorm affine) then LeakyReLU."""
    h = y_ref[...].astype(jnp.float32) * scale_ref[...] + shift_ref[...]
    o_ref[...] = jnp.where(h >= 0.0, h, neg_slope * h).astype(o_ref.dtype)


def _final_conv_kernel(pT_ref, wT_ref, b_ref, o_ref):
    """Final 1-channel conv, lane-dense: (1, K) @ (K, tm) + b -> (1, tm)."""
    o_ref[...] = (
        jnp.dot(wT_ref[...], pT_ref[...], preferred_element_type=jnp.float32)
        + b_ref[...]
    )


# ---------------------------------------------------------------------------
# pallas_call wrappers
# ---------------------------------------------------------------------------

def _pick_tile(m, cap, mult, row_bytes=0, budget=_VMEM_BUDGET):
    """Largest tile <= cap that divides m, is a multiple of `mult`, and (if
    row_bytes is given) keeps the streamed double-buffered blocks under the
    soft VMEM budget. Falls back to the full axis (always a legal block)."""
    cands = [t for t in (2048, 1024, 512, 256, 128, 64, 32, 16, 8)
             if t <= cap and t % mult == 0 and m % t == 0]
    if not cands:
        return m
    if row_bytes:
        for t in cands:                       # descending
            if t * row_bytes <= budget:
                return t
        return cands[-1]
    return cands[0]


def _conv_bias_act(patches, w, b, tile_m):
    m, k = patches.shape
    c_out = w.shape[1]
    # streamed bytes per output row: bf16 patches + bf16 out, double-buffered
    row_bytes = 2 * (2 * k) + 2 * (2 * c_out)
    tm = _pick_tile(m, tile_m, 8, row_bytes)
    return pl.pallas_call(
        functools.partial(_conv_bias_act_kernel, neg_slope=NEG_SLOPE),
        out_shape=jax.ShapeDtypeStruct((m, c_out), ACT_DTYPE),
        grid=(m // tm,),
        in_specs=[
            pl.BlockSpec((tm, k), lambda i: (i, 0)),       # streamed patches
            pl.BlockSpec((k, c_out), lambda i: (0, 0)),    # resident weights
            pl.BlockSpec((1, c_out), lambda i: (0, 0)),    # resident bias
        ],
        out_specs=pl.BlockSpec((tm, c_out), lambda i: (i, 0)),
        compiler_params=pltpu.CompilerParams(dimension_semantics=("parallel",)),
    )(patches, w, b)


def _conv_stats(patches, w, tile_m):
    m, k = patches.shape
    c_out = w.shape[1]
    row_bytes = 2 * (2 * k) + 2 * (2 * c_out)
    tm = _pick_tile(m, tile_m, 8, row_bytes)
    return pl.pallas_call(
        _conv_stats_kernel,
        out_shape=(
            jax.ShapeDtypeStruct((m, c_out), ACT_DTYPE),     # pre-BN activations
            jax.ShapeDtypeStruct((1, c_out), jnp.float32),   # per-channel sum
            jax.ShapeDtypeStruct((1, c_out), jnp.float32),   # per-channel sum sq
        ),
        grid=(m // tm,),
        in_specs=[
            pl.BlockSpec((tm, k), lambda i: (i, 0)),
            pl.BlockSpec((k, c_out), lambda i: (0, 0)),
        ],
        out_specs=(
            pl.BlockSpec((tm, c_out), lambda i: (i, 0)),
            pl.BlockSpec((1, c_out), lambda i: (0, 0)),      # resident accumulator
            pl.BlockSpec((1, c_out), lambda i: (0, 0)),      # resident accumulator
        ),
        compiler_params=pltpu.CompilerParams(dimension_semantics=("arbitrary",)),
    )(patches, w)


def _bn_act(y, scale, shift, tile_m):
    m, c = y.shape
    row_bytes = 2 * (2 * c) + 2 * (2 * c)
    tm = _pick_tile(m, tile_m, 8, row_bytes)
    return pl.pallas_call(
        functools.partial(_bn_act_kernel, neg_slope=NEG_SLOPE),
        out_shape=jax.ShapeDtypeStruct((m, c), ACT_DTYPE),
        grid=(m // tm,),
        in_specs=[
            pl.BlockSpec((tm, c), lambda i: (i, 0)),
            pl.BlockSpec((1, c), lambda i: (0, 0)),
            pl.BlockSpec((1, c), lambda i: (0, 0)),
        ],
        out_specs=pl.BlockSpec((tm, c), lambda i: (i, 0)),
        compiler_params=pltpu.CompilerParams(dimension_semantics=("parallel",)),
    )(y, scale, shift)


def _final_conv(pT, wT, b, tile_m):
    k, m = pT.shape
    row_bytes = 2 * (2 * k) + 2 * 4
    tm = _pick_tile(m, tile_m, 128, row_bytes)   # lane-dense output tiles
    return pl.pallas_call(
        _final_conv_kernel,
        out_shape=jax.ShapeDtypeStruct((1, m), jnp.float32),
        grid=(m // tm,),
        in_specs=[
            pl.BlockSpec((k, tm), lambda i: (0, i)),
            pl.BlockSpec((1, k), lambda i: (0, 0)),
            pl.BlockSpec((1, 1), lambda i: (0, 0)),
        ],
        out_specs=pl.BlockSpec((1, tm), lambda i: (0, i)),
        compiler_params=pltpu.CompilerParams(dimension_semantics=("parallel",)),
    )(pT, wT, b)


# ---------------------------------------------------------------------------
# Host-side glue (im2col) + full forward
# ---------------------------------------------------------------------------

def _im2col(x_nhwc, stride):
    """4x4 / pad-1 patch extraction. Returns ((M, 16*C) patches, (N, Ho, Wo))."""
    # TODO(synk): patch extraction / zero-padding is host-side XLA glue; the conv
    # matmuls, BatchNorm reductions and activations run inside the Pallas kernels.
    n, h, w, c = x_nhwc.shape
    xp = jnp.pad(x_nhwc, ((0, 0), (1, 1), (1, 1), (0, 0)))
    h_out = (h + 2 - 4) // stride + 1
    w_out = (w + 2 - 4) // stride + 1
    cols = []
    for ky in range(4):
        for kx in range(4):
            cols.append(
                xp[:, ky:ky + stride * (h_out - 1) + 1:stride,
                   kx:kx + stride * (w_out - 1) + 1:stride, :])
    patches = jnp.stack(cols, axis=3)                    # (N, Ho, Wo, 16, C)
    return patches.reshape(n * h_out * w_out, 16 * c), (n, h_out, w_out)


def _w_to_mat(w_oihw):
    """PyTorch (C_out, C_in, 4, 4) weight -> (16*C_in, C_out) matrix whose row
    order matches the im2col column order ((ky*4 + kx)*C_in + c)."""
    co, ci, kh, kw = w_oihw.shape
    return jnp.transpose(w_oihw, (2, 3, 1, 0)).reshape(kh * kw * ci, co)


def nlayer_discriminator_forward(x_nchw, layers, tile_m=1024):
    """Forward pass matching NLayerDiscriminator (training-mode BatchNorm).

    Activations are kept in bf16 (the dtype fed to the MXU anyway); MXU
    accumulation, BN statistics / affine fold and the final output are f32.
    """
    x = jnp.transpose(x_nchw, (0, 2, 3, 1)).astype(ACT_DTYPE)   # NHWC activations
    out = None
    for layer in layers:
        patches, (n, ho, wo) = _im2col(x, layer["stride"])
        m = patches.shape[0]
        w_mat = _w_to_mat(layer["w"]).astype(ACT_DTYPE)

        if layer["kind"] == "conv_leaky":
            b = layer["b"].reshape(1, -1).astype(jnp.float32)
            x = _conv_bias_act(patches, w_mat, b, tile_m).reshape(n, ho, wo, -1)

        elif layer["kind"] == "conv_bn_leaky":
            y, s, sq = _conv_stats(patches, w_mat, tile_m)
            mean = s / m
            # E[y^2] - mean^2 in f32 is fine at these scales; for very large M a
            # centered second pass / Welford combine would be preferable.
            var = jnp.maximum(sq / m - mean * mean, 0.0)
            inv_std = lax.rsqrt(var + BN_EPS)
            scale = layer["gamma"].reshape(1, -1) * inv_std
            shift = layer["beta"].reshape(1, -1) - mean * scale
            x = _bn_act(y, scale, shift, tile_m).reshape(n, ho, wo, -1)

        else:  # "conv" -- final 1-channel conv, emitted lane-dense as (1, M)
            b = layer["b"].reshape(1, 1).astype(jnp.float32)
            row = _final_conv(jnp.transpose(patches), jnp.transpose(w_mat), b, tile_m)
            out = jnp.transpose(row.reshape(n, ho, wo, 1), (0, 3, 1, 2))
    return out


# ---------------------------------------------------------------------------
# Parameters (PyTorch layout) + pure-JAX reference
# ---------------------------------------------------------------------------

def init_params(key, input_nc, ndf=64, n_layers=3):
    """Synthetic parameters in PyTorch layout (Conv2d weight: (C_out, C_in, 4, 4))."""
    keys = iter(jax.random.split(key, 4 * (n_layers + 2)))
    conv_w = lambda k, co, ci: 0.02 * jax.random.normal(k, (co, ci, 4, 4), jnp.float32)

    layers = [dict(kind="conv_leaky", stride=2,
                   w=conv_w(next(keys), ndf, input_nc),
                   b=0.02 * jax.random.normal(next(keys), (ndf,), jnp.float32))]
    nf = 1
    for n in range(1, n_layers):
        nf_prev, nf = nf, min(2 ** n, 8)
        layers.append(dict(
            kind="conv_bn_leaky", stride=2,
            w=conv_w(next(keys), ndf * nf, ndf * nf_prev),
            gamma=1.0 + 0.02 * jax.random.normal(next(keys), (ndf * nf,), jnp.float32),
            beta=0.02 * jax.random.normal(next(keys), (ndf * nf,), jnp.float32)))
    nf_prev, nf = nf, min(2 ** n_layers, 8)
    layers.append(dict(
        kind="conv_bn_leaky", stride=1,
        w=conv_w(next(keys), ndf * nf, ndf * nf_prev),
        gamma=1.0 + 0.02 * jax.random.normal(next(keys), (ndf * nf,), jnp.float32),
        beta=0.02 * jax.random.normal(next(keys), (ndf * nf,), jnp.float32)))
    layers.append(dict(kind="conv", stride=1,
                       w=conv_w(next(keys), 1, ndf * nf),
                       b=0.02 * jax.random.normal(next(keys), (1,), jnp.float32)))
    return layers


def reference_forward(x_nchw, layers):
    """Pure-JAX/XLA reference matching the PyTorch module (training-mode BN)."""
    x = x_nchw.astype(jnp.float32)
    for layer in layers:
        s = layer["stride"]
        y = lax.conv_general_dilated(
            x, layer["w"], window_strides=(s, s), padding=((1, 1), (1, 1)),
            dimension_numbers=("NCHW", "OIHW", "NCHW"))
        if layer["kind"] == "conv_leaky":
            y = y + layer["b"].reshape(1, -1, 1, 1)
            x = jnp.where(y >= 0, y, NEG_SLOPE * y)
        elif layer["kind"] == "conv_bn_leaky":
            mean = jnp.mean(y, axis=(0, 2, 3), keepdims=True)
            var = jnp.mean((y - mean) ** 2, axis=(0, 2, 3), keepdims=True)
            yn = (y - mean) * lax.rsqrt(var + BN_EPS)
            yn = (yn * layer["gamma"].reshape(1, -1, 1, 1)
                  + layer["beta"].reshape(1, -1, 1, 1))
            x = jnp.where(yn >= 0, yn, NEG_SLOPE * yn)
        else:
            x = y + layer["b"].reshape(1, -1, 1, 1)
    return x


if __name__ == "__main__":
    key = jax.random.PRNGKey(0)
    k_x, k_p = jax.random.split(key)

    # Small-but-valid shapes: the 5-deep stack of 4x4 convs (strides 2,2,2,1,1
    # with pad 1) needs >= 24 px of input; 32x32 yields a (N, 1, 2, 2) patch map.
    # ndf is shrunk from 64 to 8 to keep the toy run fast.
    N, C_IN, HW, NDF, N_LAYERS = 2, 4, 32, 8, 3

    x = jax.random.normal(k_x, (N, C_IN, HW, HW), jnp.float32)
    layers = init_params(k_p, C_IN, NDF, N_LAYERS)

    # tile_m=64 is deliberately tiny so the 1-D grids and the resident
    # sum/sumsq accumulators execute with >1 grid step even at this toy size;
    # use the default 1024 (or 2048) at realistic image sizes.
    fwd = jax.jit(functools.partial(nlayer_discriminator_forward,
                                    layers=layers, tile_m=64))
    out = jax.block_until_ready(fwd(x))

    ref = reference_forward(x, layers)
    assert out.shape == ref.shape == (N, 1, 2, 2), (out.shape, ref.shape)
    max_err = float(jnp.max(jnp.abs(out - ref)))
    assert max_err < 5e-2, max_err   # bf16 MXU operands / activations vs f32 reference

    print("KERNEL_OK")
</pallas_src>

<mosaic_0001>
module attributes {stable_mosaic.version = 11 : i64} {
  func.func @_conv_bias_act_kernel(%arg0: i32, %arg1: memref<64x64xbf16, #tpu.memory_space<vmem>>, %arg2: memref<64x8xbf16, #tpu.memory_space<vmem>>, %arg3: memref<1x8xf32, #tpu.memory_space<vmem>>, %arg4: memref<64x8xbf16, #tpu.memory_space<vmem>>) attributes {dimension_semantics = [#tpu.dimension_semantics<parallel>], iteration_bounds = array<i64: 8>, scalar_prefetch = 0 : i64, scratch_operands = 0 : i64, tpu.core_type = #tpu.core_type<tc>, window_params = [{transform_indices = @transform_0, window_bounds = array<i64: 64, 64>}, {pipeline_mode = #tpu.pipeline_mode<synchronous>, transform_indices = @transform_1, window_bounds = array<i64: 64, 8>}, {pipeline_mode = #tpu.pipeline_mode<synchronous>, transform_indices = @transform_2, window_bounds = array<i64: 1, 8>}, {transform_indices = @transform_3, window_bounds = array<i64: 64, 8>}]} {
    %c0 = arith.constant 0 : index
    %c0_0 = arith.constant 0 : index
    %0 = vector.load %arg1[%c0, %c0_0] : memref<64x64xbf16, #tpu.memory_space<vmem>>, vector<64x64xbf16>
    %c0_1 = arith.constant 0 : index
    %c0_2 = arith.constant 0 : index
    %1 = vector.load %arg2[%c0_1, %c0_2] : memref<64x8xbf16, #tpu.memory_space<vmem>>, vector<64x8xbf16>
    %cst = arith.constant dense<0.000000e+00> : vector<64x8xf32>
    %2 = tpu.matmul %0, %1, %cst {dimension_numbers = #tpu.dot_dimension_numbers<[1], [0], [0], [1], [0, 0, 1, 1], [], []>} : vector<64x64xbf16>, vector<64x8xbf16>, vector<64x8xf32> -> vector<64x8xf32>
    %c0_3 = arith.constant 0 : index
    %c0_4 = arith.constant 0 : index
    %3 = vector.load %arg3[%c0_3, %c0_4] : memref<1x8xf32, #tpu.memory_space<vmem>>, vector<1x8xf32>
    %4 = vector.broadcast %3 : vector<1x8xf32> to vector<64x8xf32>
    %5 = arith.addf %2, %4 : vector<64x8xf32>
    %cst_5 = arith.constant 0.000000e+00 : f32
    %6 = vector.broadcast %cst_5 : f32 to vector<64x8xf32>
    %7 = arith.cmpf oge, %5, %6 : vector<64x8xf32>
    %cst_6 = arith.constant 2.000000e-01 : f32
    %8 = vector.broadcast %cst_6 : f32 to vector<64x8xf32>
    %9 = arith.mulf %8, %5 : vector<64x8xf32>
    %10 = arith.select %7, %5, %9 : vector<64x8xi1>, vector<64x8xf32>
    %11 = arith.truncf %10 : vector<64x8xf32> to vector<64x8xbf16>
    %c0_7 = arith.constant 0 : index
    %c0_8 = arith.constant 0 : index
    %12 = vector.load %arg4[%c0_7, %c0_8] : memref<64x8xbf16, #tpu.memory_space<vmem>>, vector<64x8xbf16>
    tpu.vector_store %arg4[%c0_7, %c0_8], %11 {strides = array<i32>} : memref<64x8xbf16, #tpu.memory_space<vmem>>, vector<64x8xbf16>,
    return
  }
  func.func @transform_0(%arg0: i32) -> (i32, i32) {
    %c0_i32 = arith.constant 0 : i32
    %c0_i32_0 = arith.constant 0 : i32
    return %arg0, %c0_i32 : i32, i32
  }
  func.func @transform_1(%arg0: i32) -> (i32, i32) {
    %c0_i32 = arith.constant 0 : i32
    %c0_i32_0 = arith.constant 0 : i32
    %c0_i32_1 = arith.constant 0 : i32
    return %c0_i32, %c0_i32_0 : i32, i32
  }
  func.func @transform_2(%arg0: i32) -> (i32, i32) {
    %c0_i32 = arith.constant 0 : i32
    %c0_i32_0 = arith.constant 0 : i32
    %c0_i32_1 = arith.constant 0 : i32
    return %c0_i32, %c0_i32_0 : i32, i32
  }
  func.func @transform_3(%arg0: i32) -> (i32, i32) {
    %c0_i32 = arith.constant 0 : i32
    %c0_i32_0 = arith.constant 0 : i32
    return %arg0, %c0_i32 : i32, i32
  }
}

module attributes {stable_mosaic.version = 11 : i64} {
  func.func @_conv_stats_kernel(%arg0: i32, %arg1: memref<64x128xbf16, #tpu.memory_space<vmem>>, %arg2: memref<128x16xbf16, #tpu.memory_space<vmem>>, %arg3: memref<64x16xbf16, #tpu.memory_space<vmem>>, %arg4: memref<1x16xf32, #tpu.memory_space<vmem>>, %arg5: memref<1x16xf32, #tpu.memory_space<vmem>>) attributes {dimension_semantics = [#tpu.dimension_semantics<arbitrary>], iteration_bounds = array<i64: 2>, scalar_prefetch = 0 : i64, scratch_operands = 0 : i64, tpu.core_type = #tpu.core_type<tc>, window_params = [{transform_indices = @transform_0, window_bounds = array<i64: 64, 128>}, {pipeline_mode = #tpu.pipeline_mode<synchronous>, transform_indices = @transform_1, window_bounds = array<i64: 128, 16>}, {transform_indices = @transform_2, window_bounds = array<i64: 64, 16>}, {pipeline_mode = #tpu.pipeline_mode<synchronous>, transform_indices = @transform_3, window_bounds = array<i64: 1, 16>}, {pipeline_mode = #tpu.pipeline_mode<synchronous>, transform_indices = @transform_4, window_bounds = array<i64: 1, 16>}]} {
    %c0 = arith.constant 0 : index
    %c0_0 = arith.constant 0 : index
    %0 = vector.load %arg1[%c0, %c0_0] : memref<64x128xbf16, #tpu.memory_space<vmem>>, vector<64x128xbf16>
    %c0_1 = arith.constant 0 : index
    %c0_2 = arith.constant 0 : index
    %1 = vector.load %arg2[%c0_1, %c0_2] : memref<128x16xbf16, #tpu.memory_space<vmem>>, vector<128x16xbf16>
    %cst = arith.constant dense<0.000000e+00> : vector<64x16xf32>
    %2 = tpu.matmul %0, %1, %cst {dimension_numbers = #tpu.dot_dimension_numbers<[1], [0], [0], [1], [0, 0, 1, 1], [], []>} : vector<64x128xbf16>, vector<128x16xbf16>, vector<64x16xf32> -> vector<64x16xf32>
    %3 = arith.truncf %2 : vector<64x16xf32> to vector<64x16xbf16>
    %c0_3 = arith.constant 0 : index
    %c0_4 = arith.constant 0 : index
    %4 = vector.load %arg3[%c0_3, %c0_4] : memref<64x16xbf16, #tpu.memory_space<vmem>>, vector<64x16xbf16>
    tpu.vector_store %arg3[%c0_3, %c0_4], %3 {strides = array<i32>} : memref<64x16xbf16, #tpu.memory_space<vmem>>, vector<64x16xbf16>,
    %c0_i32 = arith.constant 0 : i32
    %5 = arith.cmpi eq, %arg0, %c0_i32 : i32
    %6 = arith.extui %5 : i1 to i32
    %c0_i32_5 = arith.constant 0 : i32
    %7 = arith.cmpi ne, %6, %c0_i32_5 : i32
    scf.if %7 {
      %cst_16 = arith.constant 0.000000e+00 : f32
      %19 = vector.broadcast %cst_16 : f32 to vector<1x16xf32>
      %c0_17 = arith.constant 0 : index
      %c0_18 = arith.constant 0 : index
      %20 = vector.load %arg4[%c0_17, %c0_18] : memref<1x16xf32, #tpu.memory_space<vmem>>, vector<1x16xf32>
      tpu.vector_store %arg4[%c0_17, %c0_18], %19 {strides = array<i32>} : memref<1x16xf32, #tpu.memory_space<vmem>>, vector<1x16xf32>,
      %cst_19 = arith.constant 0.000000e+00 : f32
      %21 = vector.broadcast %cst_19 : f32 to vector<1x16xf32>
      %c0_20 = arith.constant 0 : index
      %c0_21 = arith.constant 0 : index
      %22 = vector.load %arg5[%c0_20, %c0_21] : memref<1x16xf32, #tpu.memory_space<vmem>>, vector<1x16xf32>
      tpu.vector_store %arg5[%c0_20, %c0_21], %21 {strides = array<i32>} : memref<1x16xf32, #tpu.memory_space<vmem>>, vector<1x16xf32>,
    } else {
    }
    %c0_6 = arith.constant 0 : index
    %c0_7 = arith.constant 0 : index
    %8 = vector.load %arg4[%c0_6, %c0_7] : memref<1x16xf32, #tpu.memory_space<vmem>>, vector<1x16xf32>
    %cst_8 = arith.constant dense<0.000000e+00> : vector<16xf32>
    %9 = vector.multi_reduction <add>, %2, %cst_8 [0] : vector<64x16xf32> to vector<16xf32>
    %10 = vector.shape_cast %9 : vector<16xf32> to vector<1x16xf32>
    %11 = arith.addf %8, %10 : vector<1x16xf32>
    %c0_9 = arith.constant 0 : index
    %c0_10 = arith.constant 0 : index
    %12 = vector.load %arg4[%c0_9, %c0_10] : memref<1x16xf32, #tpu.memory_space<vmem>>, vector<1x16xf32>
    tpu.vector_store %arg4[%c0_9, %c0_10], %11 {strides = array<i32>} : memref<1x16xf32, #tpu.memory_space<vmem>>, vector<1x16xf32>,
    %c0_11 = arith.constant 0 : index
    %c0_12 = arith.constant 0 : index
    %13 = vector.load %arg5[%c0_11, %c0_12] : memref<1x16xf32, #tpu.memory_space<vmem>>, vector<1x16xf32>
    %14 = arith.mulf %2, %2 : vector<64x16xf32>
    %cst_13 = arith.constant dense<0.000000e+00> : vector<16xf32>
    %15 = vector.multi_reduction <add>, %14, %cst_13 [0] : vector<64x16xf32> to vector<16xf32>
    %16 = vector.shape_cast %15 : vector<16xf32> to vector<1x16xf32>
    %17 = arith.addf %13, %16 : vector<1x16xf32>
    %c0_14 = arith.constant 0 : index
    %c0_15 = arith.constant 0 : index
    %18 = vector.load %arg5[%c0_14, %c0_15] : memref<1x16xf32, #tpu.memory_space<vmem>>, vector<1x16xf32>
    tpu.vector_store %arg5[%c0_14, %c0_15], %17 {strides = array<i32>} : memref<1x16xf32, #tpu.memory_space<vmem>>, vector<1x16xf32>,
    return
  }
  func.func @transform_0(%arg0: i32) -> (i32, i32) {
    %c0_i32 = arith.constant 0 : i32
    %c0_i32_0 = arith.constant 0 : i32
    return %arg0, %c0_i32 : i32, i32
  }
  func.func @transform_1(%arg0: i32) -> (i32, i32) {
    %c0_i32 = arith.constant 0 : i32
    %c0_i32_0 = arith.constant 0 : i32
    %c0_i32_1 = arith.constant 0 : i32
    return %c0_i32, %c0_i32_0 : i32, i32
  }
  func.func @transform_2(%arg0: i32) -> (i32, i32) {
    %c0_i32 = arith.constant 0 : i32
    %c0_i32_0 = arith.constant 0 : i32
    return %arg0, %c0_i32 : i32, i32
  }
  func.func @transform_3(%arg0: i32) -> (i32, i32) {
    %c0_i32 = arith.constant 0 : i32
    %c0_i32_0 = arith.constant 0 : i32
    %c0_i32_1 = arith.constant 0 : i32
    return %c0_i32, %c0_i32_0 : i32, i32
  }
  func.func @transform_4(%arg0: i32) -> (i32, i32) {
    %c0_i32 = arith.constant 0 : i32
    %c0_i32_0 = arith.constant 0 : i32
    %c0_i32_1 = arith.constant 0 : i32
    return %c0_i32, %c0_i32_0 : i32, i32
  }
}

module attributes {stable_mosaic.version = 11 : i64} {
  func.func @_bn_act_kernel(%arg0: i32, %arg1: memref<64x16xbf16, #tpu.memory_space<vmem>>, %arg2: memref<1x16xf32, #tpu.memory_space<vmem>>, %arg3: memref<1x16xf32, #tpu.memory_space<vmem>>, %arg4: memref<64x16xbf16, #tpu.memory_space<vmem>>) attributes {dimension_semantics = [#tpu.dimension_semantics<parallel>], iteration_bounds = array<i64: 2>, scalar_prefetch = 0 : i64, scratch_operands = 0 : i64, tpu.core_type = #tpu.core_type<tc>, window_params = [{transform_indices = @transform_0, window_bounds = array<i64: 64, 16>}, {pipeline_mode = #tpu.pipeline_mode<synchronous>, transform_indices = @transform_1, window_bounds = array<i64: 1, 16>}, {pipeline_mode = #tpu.pipeline_mode<synchronous>, transform_indices = @transform_2, window_bounds = array<i64: 1, 16>}, {transform_indices = @transform_3, window_bounds = array<i64: 64, 16>}]} {
    %c0 = arith.constant 0 : index
    %c0_0 = arith.constant 0 : index
    %0 = vector.load %arg1[%c0, %c0_0] : memref<64x16xbf16, #tpu.memory_space<vmem>>, vector<64x16xbf16>
    %1 = arith.extf %0 : vector<64x16xbf16> to vector<64x16xf32>
    %c0_1 = arith.constant 0 : index
    %c0_2 = arith.constant 0 : index
    %2 = vector.load %arg2[%c0_1, %c0_2] : memref<1x16xf32, #tpu.memory_space<vmem>>, vector<1x16xf32>
    %3 = vector.broadcast %2 : vector<1x16xf32> to vector<64x16xf32>
    %4 = arith.mulf %1, %3 : vector<64x16xf32>
    %c0_3 = arith.constant 0 : index
    %c0_4 = arith.constant 0 : index
    %5 = vector.load %arg3[%c0_3, %c0_4] : memref<1x16xf32, #tpu.memory_space<vmem>>, vector<1x16xf32>
    %6 = vector.broadcast %5 : vector<1x16xf32> to vector<64x16xf32>
    %7 = arith.addf %4, %6 : vector<64x16xf32>
    %cst = arith.constant 0.000000e+00 : f32
    %8 = vector.broadcast %cst : f32 to vector<64x16xf32>
    %9 = arith.cmpf oge, %7, %8 : vector<64x16xf32>
    %cst_5 = arith.constant 2.000000e-01 : f32
    %10 = vector.broadcast %cst_5 : f32 to vector<64x16xf32>
    %11 = arith.mulf %10, %7 : vector<64x16xf32>
    %12 = arith.select %9, %7, %11 : vector<64x16xi1>, vector<64x16xf32>
    %13 = arith.truncf %12 : vector<64x16xf32> to vector<64x16xbf16>
    %c0_6 = arith.constant 0 : index
    %c0_7 = arith.constant 0 : index
    %14 = vector.load %arg4[%c0_6, %c0_7] : memref<64x16xbf16, #tpu.memory_space<vmem>>, vector<64x16xbf16>
    tpu.vector_store %arg4[%c0_6, %c0_7], %13 {strides = array<i32>} : memref<64x16xbf16, #tpu.memory_space<vmem>>, vector<64x16xbf16>,
    return
  }
  func.func @transform_0(%arg0: i32) -> (i32, i32) {
    %c0_i32 = arith.constant 0 : i32
    %c0_i32_0 = arith.constant 0 : i32
    return %arg0, %c0_i32 : i32, i32
  }
  func.func @transform_1(%arg0: i32) -> (i32, i32) {
    %c0_i32 = arith.constant 0 : i32
    %c0_i32_0 = arith.constant 0 : i32
    %c0_i32_1 = arith.constant 0 : i32
    return %c0_i32, %c0_i32_0 : i32, i32
  }
  func.func @transform_2(%arg0: i32) -> (i32, i32) {
    %c0_i32 = arith.constant 0 : i32
    %c0_i32_0 = arith.constant 0 : i32
    %c0_i32_1 = arith.constant 0 : i32
    return %c0_i32, %c0_i32_0 : i32, i32
  }
  func.func @transform_3(%arg0: i32) -> (i32, i32) {
    %c0_i32 = arith.constant 0 : i32
    %c0_i32_0 = arith.constant 0 : i32
    return %arg0, %c0_i32 : i32, i32
  }
}

module attributes {stable_mosaic.version = 11 : i64} {
  func.func @_conv_stats_kernel(%arg0: i32, %arg1: memref<32x256xbf16, #tpu.memory_space<vmem>>, %arg2: memref<256x32xbf16, #tpu.memory_space<vmem>>, %arg3: memref<32x32xbf16, #tpu.memory_space<vmem>>, %arg4: memref<1x32xf32, #tpu.memory_space<vmem>>, %arg5: memref<1x32xf32, #tpu.memory_space<vmem>>) attributes {dimension_semantics = [#tpu.dimension_semantics<arbitrary>], iteration_bounds = array<i64: 1>, scalar_prefetch = 0 : i64, scratch_operands = 0 : i64, tpu.core_type = #tpu.core_type<tc>, window_params = [{transform_indices = @transform_0, window_bounds = array<i64: 32, 256>}, {pipeline_mode = #tpu.pipeline_mode<synchronous>, transform_indices = @transform_1, window_bounds = array<i64: 256, 32>}, {transform_indices = @transform_2, window_bounds = array<i64: 32, 32>}, {pipeline_mode = #tpu.pipeline_mode<synchronous>, transform_indices = @transform_3, window_bounds = array<i64: 1, 32>}, {pipeline_mode = #tpu.pipeline_mode<synchronous>, transform_indices = @transform_4, window_bounds = array<i64: 1, 32>}]} {
    %c0 = arith.constant 0 : index
    %c0_0 = arith.constant 0 : index
    %0 = vector.load %arg1[%c0, %c0_0] : memref<32x256xbf16, #tpu.memory_space<vmem>>, vector<32x256xbf16>
    %c0_1 = arith.constant 0 : index
    %c0_2 = arith.constant 0 : index
    %1 = vector.load %arg2[%c0_1, %c0_2] : memref<256x32xbf16, #tpu.memory_space<vmem>>, vector<256x32xbf16>
    %cst = arith.constant dense<0.000000e+00> : vector<32x32xf32>
    %2 = tpu.matmul %0, %1, %cst {dimension_numbers = #tpu.dot_dimension_numbers<[1], [0], [0], [1], [0, 0, 1, 1], [], []>} : vector<32x256xbf16>, vector<256x32xbf16>, vector<32x32xf32> -> vector<32x32xf32>
    %3 = arith.truncf %2 : vector<32x32xf32> to vector<32x32xbf16>
    %c0_3 = arith.constant 0 : index
    %c0_4 = arith.constant 0 : index
    %4 = vector.load %arg3[%c0_3, %c0_4] : memref<32x32xbf16, #tpu.memory_space<vmem>>, vector<32x32xbf16>
    tpu.vector_store %arg3[%c0_3, %c0_4], %3 {strides = array<i32>} : memref<32x32xbf16, #tpu.memory_space<vmem>>, vector<32x32xbf16>,
    %c0_i32 = arith.constant 0 : i32
    %5 = arith.cmpi eq, %arg0, %c0_i32 : i32
    %6 = arith.extui %5 : i1 to i32
    %c0_i32_5 = arith.constant 0 : i32
    %7 = arith.cmpi ne, %6, %c0_i32_5 : i32
    scf.if %7 {
      %cst_16 = arith.constant 0.000000e+00 : f32
      %19 = vector.broadcast %cst_16 : f32 to vector<1x32xf32>
      %c0_17 = arith.constant 0 : index
      %c0_18 = arith.constant 0 : index
      %20 = vector.load %arg4[%c0_17, %c0_18] : memref<1x32xf32, #tpu.memory_space<vmem>>, vector<1x32xf32>
      tpu.vector_store %arg4[%c0_17, %c0_18], %19 {strides = array<i32>} : memref<1x32xf32, #tpu.memory_space<vmem>>, vector<1x32xf32>,
      %cst_19 = arith.constant 0.000000e+00 : f32
      %21 = vector.broadcast %cst_19 : f32 to vector<1x32xf32>
      %c0_20 = arith.constant 0 : index
      %c0_21 = arith.constant 0 : index
      %22 = vector.load %arg5[%c0_20, %c0_21] : memref<1x32xf32, #tpu.memory_space<vmem>>, vector<1x32xf32>
      tpu.vector_store %arg5[%c0_20, %c0_21], %21 {strides = array<i32>} : memref<1x32xf32, #tpu.memory_space<vmem>>, vector<1x32xf32>,
    } else {
    }
    %c0_6 = arith.constant 0 : index
    %c0_7 = arith.constant 0 : index
    %8 = vector.load %arg4[%c0_6, %c0_7] : memref<1x32xf32, #tpu.memory_space<vmem>>, vector<1x32xf32>
    %cst_8 = arith.constant dense<0.000000e+00> : vector<32xf32>
    %9 = vector.multi_reduction <add>, %2, %cst_8 [0] : vector<32x32xf32> to vector<32xf32>
    %10 = vector.shape_cast %9 : vector<32xf32> to vector<1x32xf32>
    %11 = arith.addf %8, %10 : vector<1x32xf32>
    %c0_9 = arith.constant 0 : index
    %c0_10 = arith.constant 0 : index
    %12 = vector.load %arg4[%c0_9, %c0_10] : memref<1x32xf32, #tpu.memory_space<vmem>>, vector<1x32xf32>
    tpu.vector_store %arg4[%c0_9, %c0_10], %11 {strides = array<i32>} : memref<1x32xf32, #tpu.memory_space<vmem>>, vector<1x32xf32>,
    %c0_11 = arith.constant 0 : index
    %c0_12 = arith.constant 0 : index
    %13 = vector.load %arg5[%c0_11, %c0_12] : memref<1x32xf32, #tpu.memory_space<vmem>>, vector<1x32xf32>
    %14 = arith.mulf %2, %2 : vector<32x32xf32>
    %cst_13 = arith.constant dense<0.000000e+00> : vector<32xf32>
    %15 = vector.multi_reduction <add>, %14, %cst_13 [0] : vector<32x32xf32> to vector<32xf32>
    %16 = vector.shape_cast %15 : vector<32xf32> to vector<1x32xf32>
    %17 = arith.addf %13, %16 : vector<1x32xf32>
    %c0_14 = arith.constant 0 : index
    %c0_15 = arith.constant 0 : index
    %18 = vector.load %arg5[%c0_14, %c0_15] : memref<1x32xf32, #tpu.memory_space<vmem>>, vector<1x32xf32>
    tpu.vector_store %arg5[%c0_14, %c0_15], %17 {strides = array<i32>} : memref<1x32xf32, #tpu.memory_space<vmem>>, vector<1x32xf32>,
    return
  }
  func.func @transform_0(%arg0: i32) -> (i32, i32) {
    %c0_i32 = arith.constant 0 : i32
    %c0_i32_0 = arith.constant 0 : i32
    return %arg0, %c0_i32 : i32, i32
  }
  func.func @transform_1(%arg0: i32) -> (i32, i32) {
    %c0_i32 = arith.constant 0 : i32
    %c0_i32_0 = arith.constant 0 : i32
    %c0_i32_1 = arith.constant 0 : i32
    return %c0_i32, %c0_i32_0 : i32, i32
  }
  func.func @transform_2(%arg0: i32) -> (i32, i32) {
    %c0_i32 = arith.constant 0 : i32
    %c0_i32_0 = arith.constant 0 : i32
    return %arg0, %c0_i32 : i32, i32
  }
  func.func @transform_3(%arg0: i32) -> (i32, i32) {
    %c0_i32 = arith.constant 0 : i32
    %c0_i32_0 = arith.constant 0 : i32
    %c0_i32_1 = arith.constant 0 : i32
    return %c0_i32, %c0_i32_0 : i32, i32
  }
  func.func @transform_4(%arg0: i32) -> (i32, i32) {
    %c0_i32 = arith.constant 0 : i32
    %c0_i32_0 = arith.constant 0 : i32
    %c0_i32_1 = arith.constant 0 : i32
    return %c0_i32, %c0_i32_0 : i32, i32
  }
}

module attributes {stable_mosaic.version = 11 : i64} {
  func.func @_bn_act_kernel(%arg0: i32, %arg1: memref<32x32xbf16, #tpu.memory_space<vmem>>, %arg2: memref<1x32xf32, #tpu.memory_space<vmem>>, %arg3: memref<1x32xf32, #tpu.memory_space<vmem>>, %arg4: memref<32x32xbf16, #tpu.memory_space<vmem>>) attributes {dimension_semantics = [#tpu.dimension_semantics<parallel>], iteration_bounds = array<i64: 1>, scalar_prefetch = 0 : i64, scratch_operands = 0 : i64, tpu.core_type = #tpu.core_type<tc>, window_params = [{transform_indices = @transform_0, window_bounds = array<i64: 32, 32>}, {pipeline_mode = #tpu.pipeline_mode<synchronous>, transform_indices = @transform_1, window_bounds = array<i64: 1, 32>}, {pipeline_mode = #tpu.pipeline_mode<synchronous>, transform_indices = @transform_2, window_bounds = array<i64: 1, 32>}, {transform_indices = @transform_3, window_bounds = array<i64: 32, 32>}]} {
    %c0 = arith.constant 0 : index
    %c0_0 = arith.constant 0 : index
    %0 = vector.load %arg1[%c0, %c0_0] : memref<32x32xbf16, #tpu.memory_space<vmem>>, vector<32x32xbf16>
    %1 = arith.extf %0 : vector<32x32xbf16> to vector<32x32xf32>
    %c0_1 = arith.constant 0 : index
    %c0_2 = arith.constant 0 : index
    %2 = vector.load %arg2[%c0_1, %c0_2] : memref<1x32xf32, #tpu.memory_space<vmem>>, vector<1x32xf32>
    %3 = vector.broadcast %2 : vector<1x32xf32> to vector<32x32xf32>
    %4 = arith.mulf %1, %3 : vector<32x32xf32>
    %c0_3 = arith.constant 0 : index
    %c0_4 = arith.constant 0 : index
    %5 = vector.load %arg3[%c0_3, %c0_4] : memref<1x32xf32, #tpu.memory_space<vmem>>, vector<1x32xf32>
    %6 = vector.broadcast %5 : vector<1x32xf32> to vector<32x32xf32>
    %7 = arith.addf %4, %6 : vector<32x32xf32>
    %cst = arith.constant 0.000000e+00 : f32
    %8 = vector.broadcast %cst : f32 to vector<32x32xf32>
    %9 = arith.cmpf oge, %7, %8 : vector<32x32xf32>
    %cst_5 = arith.constant 2.000000e-01 : f32
    %10 = vector.broadcast %cst_5 : f32 to vector<32x32xf32>
    %11 = arith.mulf %10, %7 : vector<32x32xf32>
    %12 = arith.select %9, %7, %11 : vector<32x32xi1>, vector<32x32xf32>
    %13 = arith.truncf %12 : vector<32x32xf32> to vector<32x32xbf16>
    %c0_6 = arith.constant 0 : index
    %c0_7 = arith.constant 0 : index
    %14 = vector.load %arg4[%c0_6, %c0_7] : memref<32x32xbf16, #tpu.memory_space<vmem>>, vector<32x32xbf16>
    tpu.vector_store %arg4[%c0_6, %c0_7], %13 {strides = array<i32>} : memref<32x32xbf16, #tpu.memory_space<vmem>>, vector<32x32xbf16>,
    return
  }
  func.func @transform_0(%arg0: i32) -> (i32, i32) {
    %c0_i32 = arith.constant 0 : i32
    %c0_i32_0 = arith.constant 0 : i32
    return %arg0, %c0_i32 : i32, i32
  }
  func.func @transform_1(%arg0: i32) -> (i32, i32) {
    %c0_i32 = arith.constant 0 : i32
    %c0_i32_0 = arith.constant 0 : i32
    %c0_i32_1 = arith.constant 0 : i32
    return %c0_i32, %c0_i32_0 : i32, i32
  }
  func.func @transform_2(%arg0: i32) -> (i32, i32) {
    %c0_i32 = arith.constant 0 : i32
    %c0_i32_0 = arith.constant 0 : i32
    %c0_i32_1 = arith.constant 0 : i32
    return %c0_i32, %c0_i32_0 : i32, i32
  }
  func.func @transform_3(%arg0: i32) -> (i32, i32) {
    %c0_i32 = arith.constant 0 : i32
    %c0_i32_0 = arith.constant 0 : i32
    return %arg0, %c0_i32 : i32, i32
  }
}

module attributes {stable_mosaic.version = 11 : i64} {
  func.func @_bn_act_kernel(%arg0: i32, %arg1: memref<18x64xbf16, #tpu.memory_space<vmem>>, %arg2: memref<1x64xf32, #tpu.memory_space<vmem>>, %arg3: memref<1x64xf32, #tpu.memory_space<vmem>>, %arg4: memref<18x64xbf16, #tpu.memory_space<vmem>>) attributes {dimension_semantics = [#tpu.dimension_semantics<parallel>], iteration_bounds = array<i64: 1>, scalar_prefetch = 0 : i64, scratch_operands = 0 : i64, tpu.core_type = #tpu.core_type<tc>, window_params = [{transform_indices = @transform_0, window_bounds = array<i64: 18, 64>}, {pipeline_mode = #tpu.pipeline_mode<synchronous>, transform_indices = @transform_1, window_bounds = array<i64: 1, 64>}, {pipeline_mode = #tpu.pipeline_mode<synchronous>, transform_indices = @transform_2, window_bounds = array<i64: 1, 64>}, {transform_indices = @transform_3, window_bounds = array<i64: 18, 64>}]} {
    %c0 = arith.constant 0 : index
    %c0_0 = arith.constant 0 : index
    %0 = vector.load %arg1[%c0, %c0_0] : memref<18x64xbf16, #tpu.memory_space<vmem>>, vector<18x64xbf16>
    %1 = arith.extf %0 : vector<18x64xbf16> to vector<18x64xf32>
    %c0_1 = arith.constant 0 : index
    %c0_2 = arith.constant 0 : index
    %2 = vector.load %arg2[%c0_1, %c0_2] : memref<1x64xf32, #tpu.memory_space<vmem>>, vector<1x64xf32>
    %3 = vector.broadcast %2 : vector<1x64xf32> to vector<18x64xf32>
    %4 = arith.mulf %1, %3 : vector<18x64xf32>
    %c0_3 = arith.constant 0 : index
    %c0_4 = arith.constant 0 : index
    %5 = vector.load %arg3[%c0_3, %c0_4] : memref<1x64xf32, #tpu.memory_space<vmem>>, vector<1x64xf32>
    %6 = vector.broadcast %5 : vector<1x64xf32> to vector<18x64xf32>
    %7 = arith.addf %4, %6 : vector<18x64xf32>
    %cst = arith.constant 0.000000e+00 : f32
    %8 = vector.broadcast %cst : f32 to vector<18x64xf32>
    %9 = arith.cmpf oge, %7, %8 : vector<18x64xf32>
    %cst_5 = arith.constant 2.000000e-01 : f32
    %10 = vector.broadcast %cst_5 : f32 to vector<18x64xf32>
    %11 = arith.mulf %10, %7 : vector<18x64xf32>
    %12 = arith.select %9, %7, %11 : vector<18x64xi1>, vector<18x64xf32>
    %13 = arith.truncf %12 : vector<18x64xf32> to vector<18x64xbf16>
    %c0_6 = arith.constant 0 : index
    %c0_7 = arith.constant 0 : index
    %14 = vector.load %arg4[%c0_6, %c0_7] : memref<18x64xbf16, #tpu.memory_space<vmem>>, vector<18x64xbf16>
    tpu.vector_store %arg4[%c0_6, %c0_7], %13 {strides = array<i32>} : memref<18x64xbf16, #tpu.memory_space<vmem>>, vector<18x64xbf16>,
    return
  }
  func.func @transform_0(%arg0: i32) -> (i32, i32) {
    %c0_i32 = arith.constant 0 : i32
    %c0_i32_0 = arith.constant 0 : i32
    return %arg0, %c0_i32 : i32, i32
  }
  func.func @transform_1(%arg0: i32) -> (i32, i32) {
    %c0_i32 = arith.constant 0 : i32
    %c0_i32_0 = arith.constant 0 : i32
    %c0_i32_1 = arith.constant 0 : i32
    return %c0_i32, %c0_i32_0 : i32, i32
  }
  func.func @transform_2(%arg0: i32) -> (i32, i32) {
    %c0_i32 = arith.constant 0 : i32
    %c0_i32_0 = arith.constant 0 : i32
    %c0_i32_1 = arith.constant 0 : i32
    return %c0_i32, %c0_i32_0 : i32, i32
  }
  func.func @transform_3(%arg0: i32) -> (i32, i32) {
    %c0_i32 = arith.constant 0 : i32
    %c0_i32_0 = arith.constant 0 : i32
    return %arg0, %c0_i32 : i32, i32
  }
}

module attributes {stable_mosaic.version = 11 : i64} {
  func.func @_conv_stats_kernel(%arg0: i32, %arg1: memref<18x512xbf16, #tpu.memory_space<vmem>>, %arg2: memref<512x64xbf16, #tpu.memory_space<vmem>>, %arg3: memref<18x64xbf16, #tpu.memory_space<vmem>>, %arg4: memref<1x64xf32, #tpu.memory_space<vmem>>, %arg5: memref<1x64xf32, #tpu.memory_space<vmem>>) attributes {dimension_semantics = [#tpu.dimension_semantics<arbitrary>], iteration_bounds = array<i64: 1>, scalar_prefetch = 0 : i64, scratch_operands = 0 : i64, tpu.core_type = #tpu.core_type<tc>, window_params = [{transform_indices = @transform_0, window_bounds = array<i64: 18, 512>}, {pipeline_mode = #tpu.pipeline_mode<synchronous>, transform_indices = @transform_1, window_bounds = array<i64: 512, 64>}, {transform_indices = @transform_2, window_bounds = array<i64: 18, 64>}, {pipeline_mode = #tpu.pipeline_mode<synchronous>, transform_indices = @transform_3, window_bounds = array<i64: 1, 64>}, {pipeline_mode = #tpu.pipeline_mode<synchronous>, transform_indices = @transform_4, window_bounds = array<i64: 1, 64>}]} {
    %c0 = arith.constant 0 : index
    %c0_0 = arith.constant 0 : index
    %0 = vector.load %arg1[%c0, %c0_0] : memref<18x512xbf16, #tpu.memory_space<vmem>>, vector<18x512xbf16>
    %c0_1 = arith.constant 0 : index
    %c0_2 = arith.constant 0 : index
    %1 = vector.load %arg2[%c0_1, %c0_2] : memref<512x64xbf16, #tpu.memory_space<vmem>>, vector<512x64xbf16>
    %cst = arith.constant dense<0.000000e+00> : vector<18x64xf32>
    %2 = tpu.matmul %0, %1, %cst {dimension_numbers = #tpu.dot_dimension_numbers<[1], [0], [0], [1], [0, 0, 1, 1], [], []>} : vector<18x512xbf16>, vector<512x64xbf16>, vector<18x64xf32> -> vector<18x64xf32>
    %3 = arith.truncf %2 : vector<18x64xf32> to vector<18x64xbf16>
    %c0_3 = arith.constant 0 : index
    %c0_4 = arith.constant 0 : index
    %4 = vector.load %arg3[%c0_3, %c0_4] : memref<18x64xbf16, #tpu.memory_space<vmem>>, vector<18x64xbf16>
    tpu.vector_store %arg3[%c0_3, %c0_4], %3 {strides = array<i32>} : memref<18x64xbf16, #tpu.memory_space<vmem>>, vector<18x64xbf16>,
    %c0_i32 = arith.constant 0 : i32
    %5 = arith.cmpi eq, %arg0, %c0_i32 : i32
    %6 = arith.extui %5 : i1 to i32
    %c0_i32_5 = arith.constant 0 : i32
    %7 = arith.cmpi ne, %6, %c0_i32_5 : i32
    scf.if %7 {
      %cst_16 = arith.constant 0.000000e+00 : f32
      %19 = vector.broadcast %cst_16 : f32 to vector<1x64xf32>
      %c0_17 = arith.constant 0 : index
      %c0_18 = arith.constant 0 : index
      %20 = vector.load %arg4[%c0_17, %c0_18] : memref<1x64xf32, #tpu.memory_space<vmem>>, vector<1x64xf32>
      tpu.vector_store %arg4[%c0_17, %c0_18], %19 {strides = array<i32>} : memref<1x64xf32, #tpu.memory_space<vmem>>, vector<1x64xf32>,
      %cst_19 = arith.constant 0.000000e+00 : f32
      %21 = vector.broadcast %cst_19 : f32 to vector<1x64xf32>
      %c0_20 = arith.constant 0 : index
      %c0_21 = arith.constant 0 : index
      %22 = vector.load %arg5[%c0_20, %c0_21] : memref<1x64xf32, #tpu.memory_space<vmem>>, vector<1x64xf32>
      tpu.vector_store %arg5[%c0_20, %c0_21], %21 {strides = array<i32>} : memref<1x64xf32, #tpu.memory_space<vmem>>, vector<1x64xf32>,
    } else {
    }
    %c0_6 = arith.constant 0 : index
    %c0_7 = arith.constant 0 : index
    %8 = vector.load %arg4[%c0_6, %c0_7] : memref<1x64xf32, #tpu.memory_space<vmem>>, vector<1x64xf32>
    %cst_8 = arith.constant dense<0.000000e+00> : vector<64xf32>
    %9 = vector.multi_reduction <add>, %2, %cst_8 [0] : vector<18x64xf32> to vector<64xf32>
    %10 = vector.shape_cast %9 : vector<64xf32> to vector<1x64xf32>
    %11 = arith.addf %8, %10 : vector<1x64xf32>
    %c0_9 = arith.constant 0 : index
    %c0_10 = arith.constant 0 : index
    %12 = vector.load %arg4[%c0_9, %c0_10] : memref<1x64xf32, #tpu.memory_space<vmem>>, vector<1x64xf32>
    tpu.vector_store %arg4[%c0_9, %c0_10], %11 {strides = array<i32>} : memref<1x64xf32, #tpu.memory_space<vmem>>, vector<1x64xf32>,
    %c0_11 = arith.constant 0 : index
    %c0_12 = arith.constant 0 : index
    %13 = vector.load %arg5[%c0_11, %c0_12] : memref<1x64xf32, #tpu.memory_space<vmem>>, vector<1x64xf32>
    %14 = arith.mulf %2, %2 : vector<18x64xf32>
    %cst_13 = arith.constant dense<0.000000e+00> : vector<64xf32>
    %15 = vector.multi_reduction <add>, %14, %cst_13 [0] : vector<18x64xf32> to vector<64xf32>
    %16 = vector.shape_cast %15 : vector<64xf32> to vector<1x64xf32>
    %17 = arith.addf %13, %16 : vector<1x64xf32>
    %c0_14 = arith.constant 0 : index
    %c0_15 = arith.constant 0 : index
    %18 = vector.load %arg5[%c0_14, %c0_15] : memref<1x64xf32, #tpu.memory_space<vmem>>, vector<1x64xf32>
    tpu.vector_store %arg5[%c0_14, %c0_15], %17 {strides = array<i32>} : memref<1x64xf32, #tpu.memory_space<vmem>>, vector<1x64xf32>,
    return
  }
  func.func @transform_0(%arg0: i32) -> (i32, i32) {
    %c0_i32 = arith.constant 0 : i32
    %c0_i32_0 = arith.constant 0 : i32
    return %arg0, %c0_i32 : i32, i32
  }
  func.func @transform_1(%arg0: i32) -> (i32, i32) {
    %c0_i32 = arith.constant 0 : i32
    %c0_i32_0 = arith.constant 0 : i32
    %c0_i32_1 = arith.constant 0 : i32
    return %c0_i32, %c0_i32_0 : i32, i32
  }
  func.func @transform_2(%arg0: i32) -> (i32, i32) {
    %c0_i32 = arith.constant 0 : i32
    %c0_i32_0 = arith.constant 0 : i32
    return %arg0, %c0_i32 : i32, i32
  }
  func.func @transform_3(%arg0: i32) -> (i32, i32) {
    %c0_i32 = arith.constant 0 : i32
    %c0_i32_0 = arith.constant 0 : i32
    %c0_i32_1 = arith.constant 0 : i32
    return %c0_i32, %c0_i32_0 : i32, i32
  }
  func.func @transform_4(%arg0: i32) -> (i32, i32) {
    %c0_i32 = arith.constant 0 : i32
    %c0_i32_0 = arith.constant 0 : i32
    %c0_i32_1 = arith.constant 0 : i32
    return %c0_i32, %c0_i32_0 : i32, i32
  }
}

module attributes {stable_mosaic.version = 11 : i64} {
  func.func @_final_conv_kernel(%arg0: i32, %arg1: memref<1024x8xbf16, #tpu.memory_space<vmem>>, %arg2: memref<1x1024xbf16, #tpu.memory_space<vmem>>, %arg3: memref<1x1xf32, #tpu.memory_space<vmem>>, %arg4: memref<1x8xf32, #tpu.memory_space<vmem>>) attributes {dimension_semantics = [#tpu.dimension_semantics<parallel>], iteration_bounds = array<i64: 1>, scalar_prefetch = 0 : i64, scratch_operands = 0 : i64, tpu.core_type = #tpu.core_type<tc>, window_params = [{transform_indices = @transform_0, window_bounds = array<i64: 1024, 8>}, {pipeline_mode = #tpu.pipeline_mode<synchronous>, transform_indices = @transform_1, window_bounds = array<i64: 1, 1024>}, {pipeline_mode = #tpu.pipeline_mode<synchronous>, transform_indices = @transform_2, window_bounds = array<i64: 1, 1>}, {transform_indices = @transform_3, window_bounds = array<i64: 1, 8>}]} {
    %c0 = arith.constant 0 : index
    %c0_0 = arith.constant 0 : index
    %0 = vector.load %arg2[%c0, %c0_0] : memref<1x1024xbf16, #tpu.memory_space<vmem>>, vector<1x1024xbf16>
    %c0_1 = arith.constant 0 : index
    %c0_2 = arith.constant 0 : index
    %1 = vector.load %arg1[%c0_1, %c0_2] : memref<1024x8xbf16, #tpu.memory_space<vmem>>, vector<1024x8xbf16>
    %cst = arith.constant dense<0.000000e+00> : vector<1x8xf32>
    %2 = tpu.matmul %0, %1, %cst {dimension_numbers = #tpu.dot_dimension_numbers<[1], [0], [0], [1], [0, 0, 1, 1], [], []>} : vector<1x1024xbf16>, vector<1024x8xbf16>, vector<1x8xf32> -> vector<1x8xf32>
    %c0_3 = arith.constant 0 : index
    %c0_4 = arith.constant 0 : index
    %3 = vector.load %arg3[%c0_3, %c0_4] : memref<1x1xf32, #tpu.memory_space<vmem>>, vector<1x1xf32>
    %4 = vector.broadcast %3 : vector<1x1xf32> to vector<1x8xf32>
    %5 = arith.addf %2, %4 : vector<1x8xf32>
    %c0_5 = arith.constant 0 : index
    %c0_6 = arith.constant 0 : index
    %6 = vector.load %arg4[%c0_5, %c0_6] : memref<1x8xf32, #tpu.memory_space<vmem>>, vector<1x8xf32>
    tpu.vector_store %arg4[%c0_5, %c0_6], %5 {strides = array<i32>} : memref<1x8xf32, #tpu.memory_space<vmem>>, vector<1x8xf32>,
    return
  }
  func.func @transform_0(%arg0: i32) -> (i32, i32) {
    %c0_i32 = arith.constant 0 : i32
    %c0_i32_0 = arith.constant 0 : i32
    return %c0_i32, %arg0 : i32, i32
  }
  func.func @transform_1(%arg0: i32) -> (i32, i32) {
    %c0_i32 = arith.constant 0 : i32
    %c0_i32_0 = arith.constant 0 : i32
    %c0_i32_1 = arith.constant 0 : i32
    return %c0_i32, %c0_i32_0 : i32, i32
  }
  func.func @transform_2(%arg0: i32) -> (i32, i32) {
    %c0_i32 = arith.constant 0 : i32
    %c0_i32_0 = arith.constant 0 : i32
    %c0_i32_1 = arith.constant 0 : i32
    return %c0_i32, %c0_i32_0 : i32, i32
  }
  func.func @transform_3(%arg0: i32) -> (i32, i32) {
    %c0_i32 = arith.constant 0 : i32
    %c0_i32_0 = arith.constant 0 : i32
    return %c0_i32, %arg0 : i32, i32
  }
}

</mosaic_0001>

<bundles_post_ra>
// kernel: nlayer_discriminator_forward.8
= control target key start
LH: loop header
LB: loop body
LE: loop exit
PB: predicated region body
PF: predicated region fallthrough
CT: control target
= control target key end

     0   :  { %s557_s12 = smov 0   ;;  %s618_s0 = inlined_call_operand.vmem [shape: bf16[512,64], index: 0, kind: input, shape index: {}]   ;;  %s619_s1 = inlined_call_operand.vmem [shape: bf16[64,8], index: 1, kind: input, shape index: {}]   ;;  %s620_s2 = inlined_call_operand.vmem [shape: f32[1,8], index: 2, kind: input, shape index: {}]   ;;  %s621_s3 = inlined_call_operand.vmem [shape: bf16[512,8], index: 3, kind: output, shape index: {}]  }
   0x1 LB: > { %s441_s13 = sadd.s32 4294967295, %s535_s12   ;;  %p445_p0 = scmp.ge.s32.totalorder %s535_s12, 1  ;;  %s535_s12 = sphi %s557_s12, %s13_s12  }
   0x2   : > { %p138_p1 = scmp.lt.s32.totalorder %s535_s12, 9 }
   0x4   : > { %p139_p2 = pnand %p445_p0, %p138_p1 }
   0x5   : > { %s446_s16 = sshll.u32 (!%p139_p2), %s441_s13, 3 }
   0x6   : > { %142 = sbr.rel (%p139_p2) target bundleno = 237 (0xed), region = 32  ;;  %p163_p3 = scmp.lt.s32.totalorder (!%p139_p2), %s446_s16, 63 }
   0xb   : > { %v521_v0 = vld [vmem:[%s619_s1 + $0x18] sm:$0xff]   ;;  %v522_v1 = vld [vmem:[%s619_s1 + $0x10] sm:$0xff]   ;;  %s623_s16 = smov (!%p163_p3, %s446_s16), 63  ;;  %v523_v2 = vld [vmem:[%s619_s1 + $0x8] sm:$0xff]   ;;  %vm242_vm0 = vcmask 523264   ;;  %vm376_vm3 = vcmask 60416  }
   0xc   : > { %489 = vmatprep.subr.bf16.mxu0 %v521_v0  ;;  %505 = vmatprep.subr.bf16.mxu1 %v521_v0  ;;  %s447_s21 = sshll.u32 %s623_s16, 2  ;;  %v524_v3 = vld [vmem:[%s619_s1] sm:$0xff]  }
   0xd   : > { %490 = vmatpush3.bf16.msra.mxu0 %v521_v0  ;;  %509 = vmatpush3.bf16.msra.mxu1 %v521_v0  ;;  %s166_s26 = scalar_lea.vmem %s618_s0, %s447_s21  ;;  %v450_v8 = vld [vmem:[%s620_s2] ss:$0 sm:$0xff]  ;;  %s597_s4 = scalar_lea.vmem %s621_s3, %s447_s21 }
   0xe   : > { %491 = vmatprep.subr.bf16.mxu0 %v522_v1  ;;  %506 = vmatprep.subr.bf16.mxu1 %v522_v1  ;;  %v525_v4 = vld [vmem:[%s166_s26] sm:$0xff]   ;;  %v526_v5 = vld [vmem:[%s166_s26 + $0x10] sm:$0xff]   ;;  %v527_v6 = vld [vmem:[%s166_s26 + $0x8] sm:$0xff]  }
   0xf   : > { %497 = vmatprep.mubr.msk.bf16.mxu0 %vm242_vm0, %v525_v4  ;;  %501 = vmatprep.mubr.msk.bf16.mxu1 %vm242_vm0, %v526_v5  ;;  %v528_v7 = vld [vmem:[%s166_s26 + $0x18] sm:$0xff]  }
  0x11   : > { %492 = vmatpush3.bf16.msra.mxu0 %v522_v1  ;;  %510 = vmatpush3.bf16.msra.mxu1 %v522_v1 }
  0x12   : > { %493 = vmatprep.subr.bf16.mxu0 %v523_v2  ;;  %507 = vmatprep.subr.bf16.mxu1 %v523_v2 }
  0x15   : > { %494 = vmatpush3.bf16.msra.mxu0 %v523_v2  ;;  %511 = vmatpush3.bf16.msra.mxu1 %v523_v2 }
  0x16   : > { %495 = vmatprep.subr.bf16.mxu0 %v524_v3  ;;  %508 = vmatprep.subr.bf16.mxu1 %v524_v3 }
  0x19   : > { %496 = vmatpush3.bf16.msra.mxu0 %v524_v3  ;;  %512 = vmatpush3.bf16.msra.mxu1 %v524_v3 }
  0x1c   : > { %498 = vmatmul.mubr.msk.bf16.vlgmr.msra.gmra.mxu0 %vm242_vm0, %v527_v6  ;;  %502 = vmatmul.mubr.msk.bf16.vlgmr.msra.gmra.mxu1 %vm242_vm0, %v528_v7 }
  0xdc   : > { %v499_v9 = vpop.f32.mrf.mxu0  ;;  %v503_v10 = vpop.f32.mrf.mxu1 }
  0xdd   : > { %v298_v11 = vadd.f32 %v499_v9, %v450_v8  ;;  %v314_v12 = vadd.f32 %v503_v10, %v450_v8 }
  0xde   : > { %v289_v13 = vpop.f32.mrf.mxu0  ;;  %v305_v14 = vpop.f32.mrf.mxu1 }
  0xdf   : > { %vm322_vm1 = vcmp.ge.f32.partialorder %v298_v11, 0.0  ;;  %v330_v15 = vmul.f32 0.2, %v298_v11  ;;  %vm326_vm2 = vcmp.ge.f32.partialorder %v314_v12, 0.0  ;;  %v334_v16 = vmul.f32 0.2, %v314_v12 }
  0xe0   : > { %v290_v17 = vadd.f32 %v450_v8, %v289_v13  ;;  %v306_v18 = vadd.f32 %v450_v8, %v305_v14  ;;  %v500_v19 = vpop.f32.mrf.mxu0  ;;  %v504_v20 = vpop.f32.mrf.mxu1 }
  0xe1   : > { %v338_v21 = vsel %vm322_vm1, %v298_v11, %v330_v15  ;;  %v342_v22 = vsel %vm326_vm2, %v314_v12, %v334_v16  ;;  %v301_v23 = vadd.f32 %v500_v19, %v450_v8  ;;  %v317_v24 = vadd.f32 %v504_v20, %v450_v8 }
  0xe2   : > { %v475_v25 = vpack.c.bf16 %v338_v21, %v338_v21  ;;  %v479_v26 = vpack.c.bf16 %v342_v22, %v342_v22  ;;  %vm320_vm4 = vcmp.ge.f32.partialorder %v290_v17, 0.0  ;;  %v328_v27 = vmul.f32 0.2, %v290_v17  ;;  %v292_v28 = vpop.f32.mrf.mxu0  ;;  %v308_v29 = vpop.f32.mrf.mxu1 }
  0xe3   : > { %vm324_vm5 = vcmp.ge.f32.partialorder %v306_v18, 0.0  ;;  %v332_v30 = vmul.f32 0.2, %v306_v18  ;;  %vm323_vm6 = vcmp.ge.f32.partialorder %v301_v23, 0.0  ;;  %v331_v31 = vmul.f32 0.2, %v301_v23 }
  0xe4   : > { %379 = vst.msk [vmem:[%s597_s4 + $0x8] sm:$0xf] %vm376_vm3, %v475_v25  ;;  %383 = vst.msk [vmem:[%s597_s4 + $0x18] sm:$0xf] %vm376_vm3, %v479_v26  ;;  %v336_v32 = vsel %vm320_vm4, %v290_v17, %v328_v27  ;;  %vm327_vm7 = vcmp.ge.f32.partialorder %v317_v24, 0.0  ;;  %v293_v34 = vadd.f32 %v450_v8, %v292_v28  ;;  %v309_v38 = vadd.f32 %v450_v8, %v308_v29 }
  0xe5   : > { %v335_v33 = vmul.f32 0.2, %v317_v24  ;;  %v473_v35 = vpack.c.bf16 %v336_v32, %v336_v32  ;;  %v340_v36 = vsel %vm324_vm5, %v306_v18, %v332_v30  ;;  %v339_v37 = vsel %vm323_vm6, %v301_v23, %v331_v31 }
  0xe6   : > { %v477_v39 = vpack.c.bf16 %v340_v36, %v340_v36  ;;  %v476_v40 = vpack.c.bf16 %v339_v37, %v339_v37  ;;  %vm321_vm8 = vcmp.ge.f32.partialorder %v293_v34, 0.0  ;;  %v329_v43 = vmul.f32 0.2, %v293_v34 }
  0xe7   : > { %v343_v41 = vsel %vm327_vm7, %v317_v24, %v335_v33  ;;  %377 = vst.msk [vmem:[%s597_s4] sm:$0xf] %vm376_vm3, %v473_v35  ;;  %vm325_vm9 = vcmp.ge.f32.partialorder %v309_v38, 0.0  ;;  %v333_v44 = vmul.f32 0.2, %v309_v38 }
  0xe8   : > { %v480_v42 = vpack.c.bf16 %v343_v41, %v343_v41  ;;  %381 = vst.msk [vmem:[%s597_s4 + $0x10] sm:$0xf] %vm376_vm3, %v477_v39  ;;  %380 = vst.msk [vmem:[%s597_s4 + $0xc] sm:$0xf] %vm376_vm3, %v476_v40  ;;  %v337_v45 = vsel %vm321_vm8, %v293_v34, %v329_v43 }
  0xe9   : > { %v341_v46 = vsel %vm325_vm9, %v309_v38, %v333_v44  ;;  %v474_v47 = vpack.c.bf16 %v337_v45, %v337_v45 }
  0xea   : > { %384 = vst.msk [vmem:[%s597_s4 + $0x1c] sm:$0xf] %vm376_vm3, %v480_v42  ;;  %v478_v48 = vpack.c.bf16 %v341_v46, %v341_v46 }
  0xeb   : > { %378 = vst.msk [vmem:[%s597_s4 + $0x4] sm:$0xf] %vm376_vm3, %v474_v47 }
  0xec   : > { %382 = vst.msk [vmem:[%s597_s4 + $0x14] sm:$0xf] %vm376_vm3, %v478_v48 }
  0xed PF: > { %s13_s12 = sadd.s32 1, %s535_s12  }
  0xee   : > { %p10_p4 = scmp.ge.s32.totalorder %s13_s12, 10  }
  0xf0   :  { %12 = sbr.rel (!%p10_p4) target bundleno = 1 (0x1), region = 62 }

// kernel: nlayer_discriminator_forward.9
= control target key start
LH: loop header
LB: loop body
LE: loop exit
PB: predicated region body
PF: predicated region fallthrough
CT: control target
= control target key end

     0   :  { %s679_s15 = smov 0   ;;  %s779_s0 = inlined_call_operand.vmem [shape: bf16[128,128], index: 0, kind: input, shape index: {}]   ;;  %s780_s1 = inlined_call_operand.vmem [shape: bf16[128,16], index: 1, kind: input, shape index: {}]   ;;  %s781_s2 = inlined_call_operand.vmem [shape: bf16[128,16], index: 2, kind: output, shape index: {0}]   ;;  %s782_s3 = inlined_call_operand.vmem [shape: f32[1,16], index: 3, kind: output, shape index: {1}]   ;;  %s783_s4 = inlined_call_operand.vmem [shape: f32[1,16], index: 4, kind: output, shape index: {2}]  }
   0x1 LB: > { %s532_s16 = sadd.s32 4294967295, %s651_s15   ;;  %p536_p0 = scmp.ge.s32.totalorder %s651_s15, 1  ;;  %s651_s15 = sphi %s679_s15, %s15_s15  }
   0x2   : > { %p158_p1 = scmp.lt.s32.totalorder %s651_s15, 3 }
   0x4   : > { %p159_p2 = pnand %p536_p0, %p158_p1 }
   0x5   : > { %s537_s19 = sshll.u32 (!%p159_p2), %s532_s16, 3  ;;  %p561_p4 = scmp.ne.s32.totalorder (!%p159_p2), %s532_s16, 0 }
   0x6   : > { %162 = sbr.rel (%p159_p2) target bundleno = 281 (0x119), region = 28  ;;  %p185_p3 = scmp.lt.s32.totalorder (!%p159_p2), %s537_s19, 15 }
   0xb   : > { %v633_v0 = vld [vmem:[%s780_s1 + $0x38] sm:$0xff]   ;;  %v634_v1 = vld [vmem:[%s780_s1 + $0x30] sm:$0xff]   ;;  %s785_s19 = smov (!%p185_p3, %s537_s19), 15  ;;  %v635_v2 = vld [vmem:[%s780_s1 + $0x28] sm:$0xff]   ;;  %vm390_vm0 = vcmask 125952  }
   0xc   : > { %584 = vmatprep.subr.bf16.mxu0 %v633_v0  ;;  %608 = vmatprep.subr.bf16.mxu1 %v633_v0  ;;  %s538_s24 = sshll.u32 %s785_s19, 2  ;;  %v636_v3 = vld [vmem:[%s780_s1 + $0x20] sm:$0xff]   ;;  %v637_v6 = vld [vmem:[%s780_s1 + $0x18] sm:$0xff]   ;;  %v638_v7 = vld [vmem:[%s780_s1 + $0x10] sm:$0xff]  }
   0xd   : > { %585 = vmatpush3.bf16.msra.mxu0 %v633_v0  ;;  %616 = vmatpush3.bf16.msra.mxu1 %v633_v0  ;;  %s706_s27 = scalar_lea.vmem %s779_s0, %s538_s24  ;;  %v639_v8 = vld [vmem:[%s780_s1 + $0x8] sm:$0xff]   ;;  %v640_v9 = vld [vmem:[%s780_s1] sm:$0xff]   ;;  %s194_s14 = scalar_lea.vmem %s781_s2, %s538_s24 }
   0xe   : > { %586 = vmatprep.subr.bf16.mxu0 %v634_v1  ;;  %609 = vmatprep.subr.bf16.mxu1 %v634_v1  ;;  %v641_v4 = vld [vmem:[%s706_s27] sm:$0xff]   ;;  %v642_v5 = vld [vmem:[%s706_s27 + $0x10] sm:$0xff]   ;;  %v643_v10 = vld [vmem:[%s706_s27 + $0x8] sm:$0xff]  }
   0xf   : > { %600 = vmatprep.mubr.bf16.mxu0 %v641_v4  ;;  %604 = vmatprep.mubr.bf16.mxu1 %v642_v5  ;;  %v644_v11 = vld [vmem:[%s706_s27 + $0x18] sm:$0xff]  }
  0x11   : > { %587 = vmatpush3.bf16.msra.mxu0 %v634_v1  ;;  %617 = vmatpush3.bf16.msra.mxu1 %v634_v1 }
  0x12   : > { %588 = vmatprep.subr.bf16.mxu0 %v635_v2  ;;  %610 = vmatprep.subr.bf16.mxu1 %v635_v2 }
  0x15   : > { %589 = vmatpush3.bf16.msra.mxu0 %v635_v2  ;;  %618 = vmatpush3.bf16.msra.mxu1 %v635_v2 }
  0x16   : > { %590 = vmatprep.subr.bf16.mxu0 %v636_v3  ;;  %611 = vmatprep.subr.bf16.mxu1 %v636_v3 }
  0x19   : > { %591 = vmatpush3.bf16.msra.mxu0 %v636_v3  ;;  %619 = vmatpush3.bf16.msra.mxu1 %v636_v3 }
  0x1a   : > { %592 = vmatprep.subr.bf16.mxu0 %v637_v6  ;;  %612 = vmatprep.subr.bf16.mxu1 %v637_v6 }
  0x1d   : > { %593 = vmatpush3.bf16.msra.mxu0 %v637_v6  ;;  %620 = vmatpush3.bf16.msra.mxu1 %v637_v6 }
  0x1e   : > { %594 = vmatprep.subr.bf16.mxu0 %v638_v7  ;;  %613 = vmatprep.subr.bf16.mxu1 %v638_v7 }
  0x21   : > { %595 = vmatpush3.bf16.msra.mxu0 %v638_v7  ;;  %621 = vmatpush3.bf16.msra.mxu1 %v638_v7 }
  0x22   : > { %596 = vmatprep.subr.bf16.mxu0 %v639_v8  ;;  %614 = vmatprep.subr.bf16.mxu1 %v639_v8 }
  0x25   : > { %597 = vmatpush3.bf16.msra.mxu0 %v639_v8  ;;  %622 = vmatpush3.bf16.msra.mxu1 %v639_v8 }
  0x26   : > { %598 = vmatprep.subr.bf16.mxu0 %v640_v9  ;;  %615 = vmatprep.subr.bf16.mxu1 %v640_v9 }
  0x29   : > { %599 = vmatpush3.bf16.msra.mxu0 %v640_v9  ;;  %623 = vmatpush3.bf16.msra.mxu1 %v640_v9 }
  0x2c   : > { %601 = vmatmul.mubr.bf16.vlgmr.msra.gmra.mxu0 %v643_v10  ;;  %605 = vmatmul.mubr.bf16.vlgmr.msra.gmra.mxu1 %v644_v11 }
  0xec   : > { %v602_v12 = vpop.f32.mrf.mxu0  ;;  %v606_v13 = vpop.f32.mrf.mxu1 }
  0xed   : > { %v566_v14 = vpack.c.bf16 %v602_v12, %v602_v12  ;;  %v570_v15 = vpack.c.bf16 %v606_v13, %v606_v13 }
  0xee   : > { %v327_v16 = vpop.f32.mrf.mxu0  ;;  %v343_v17 = vpop.f32.mrf.mxu1 }
  0xef   : > { %393 = vst.msk [vmem:[%s194_s14 + $0x8] sm:$0xf] %vm390_vm0, %v566_v14  ;;  %397 = vst.msk [vmem:[%s194_s14 + $0x18] sm:$0xf] %vm390_vm0, %v570_v15  ;;  %v564_v18 = vpack.c.bf16 %v327_v16, %v327_v16  ;;  %v568_v19 = vpack.c.bf16 %v343_v17, %v343_v17 }
  0xf0   : > { %v603_v20 = vpop.f32.mrf.mxu0  ;;  %v607_v21 = vpop.f32.mrf.mxu1 }
  0xf1   : > { %391 = vst.msk [vmem:[%s194_s14] sm:$0xf] %vm390_vm0, %v564_v18  ;;  %395 = vst.msk [vmem:[%s194_s14 + $0x10] sm:$0xf] %vm390_vm0, %v568_v19  ;;  %v567_v22 = vpack.c.bf16 %v603_v20, %v603_v20  ;;  %v571_v23 = vpack.c.bf16 %v607_v21, %v607_v21  ;;  %402 = sbr.rel (%p561_p4) target bundleno = 248 (0xf8), region = 32 }
  0xf2   : > { %v330_v24 = vpop.f32.mrf.mxu0  ;;  %v346_v25 = vpop.f32.mrf.mxu1 }
  0xf3   : > { %394 = vst.msk [vmem:[%s194_s14 + $0xc] sm:$0xf] %vm390_vm0, %v567_v22  ;;  %398 = vst.msk [vmem:[%s194_s14 + $0x1c] sm:$0xf] %vm390_vm0, %v571_v23  ;;  %v565_v26 = vpack.c.bf16 %v330_v24, %v330_v24  ;;  %v569_v27 = vpack.c.bf16 %v346_v25, %v346_v25 }
  0xf5   : > { %392 = vst.msk [vmem:[%s194_s14 + $0x4] sm:$0xf] %vm390_vm0, %v565_v26  ;;  %396 = vst.msk [vmem:[%s194_s14 + $0x14] sm:$0xf] %vm390_vm0, %v569_v27 }
  0xf6   : > { %vm403_vm1 = vcmask 122880   ;;  %v653_v28 = vmov 0.0  }
  0xf7   : > { %404 = vst.msk [vmem:[%s782_s3] sm:$0x1] %vm403_vm1, %v653_v28  ;;  %405 = vst.msk [vmem:[%s783_s4] sm:$0x1] %vm403_vm1, %v653_v28 }
  0xf8 PF: > { %vm407_vm2 = vcmask 130048   ;;  %v433_v29 = vmul.f32 %v327_v16, %v327_v16  ;;  %v434_v33 = vmul.f32 %v330_v24, %v330_v24  ;;  %v435_v36 = vmul.f32 %v602_v12, %v602_v12 }
  0xf9   : > { %v408_v30 = vsel %vm407_vm2, %v327_v16, 0.0  ;;  %v409_v31 = vsel %vm407_vm2, %v330_v24, 0.0  ;;  %v411_v32 = vsel %vm407_vm2, %v602_v12, 0.0  ;;  %v413_v35 = vsel %vm407_vm2, %v603_v20, 0.0 }
  0xfa   : > { %v410_v34 = vadd.f32 %v409_v31, %v408_v30  ;;  %v436_v37 = vmul.f32 %v603_v20, %v603_v20  ;;  %v415_v39 = vsel %vm407_vm2, %v343_v17, 0.0  ;;  %v437_v40 = vmul.f32 %v343_v17, %v343_v17 }
  0xfb   : > { %v441_v41 = vsel %vm407_vm2, %v433_v29, 0.0  ;;  %v442_v42 = vsel %vm407_vm2, %v434_v33, 0.0  ;;  %v444_v43 = vsel %vm407_vm2, %v435_v36, 0.0  ;;  %v417_v46 = vsel %vm407_vm2, %v346_v25, 0.0 }
  0xfc   : > { %v412_v38 = vadd.f32 %v411_v32, %v410_v34  ;;  %v443_v45 = vadd.f32 %v442_v42, %v441_v41  ;;  %v438_v47 = vmul.f32 %v346_v25, %v346_v25  ;;  %v446_v48 = vsel %vm407_vm2, %v436_v37, 0.0 }
  0xfd   : > { %v419_v51 = vsel %vm407_vm2, %v606_v13, 0.0  ;;  %v439_v52 = vmul.f32 %v606_v13, %v606_v13  ;;  %v448_v53 = vsel %vm407_vm2, %v437_v40, 0.0  ;;  %v421_v56 = vsel %vm407_vm2, %v607_v21, 0.0 }
  0xfe   : > { %v414_v44 = vadd.f32 %v413_v35, %v412_v38  ;;  %v445_v50 = vadd.f32 %v444_v43, %v443_v45  ;;  %v440_v57 = vmul.f32 %v607_v21, %v607_v21  ;;  %v450_v58 = vsel %vm407_vm2, %v438_v47, 0.0  ;;  %v406_v11 = vld [vmem:[%s782_s3] sm:$0x1] }
  0xff   : > { %v452_v61 = vsel %vm407_vm2, %v439_v52, 0.0  ;;  %vm430_vm3 = vcmask 122880   ;;  %v432_v16 = vld [vmem:[%s783_s4] sm:$0x1] }
 0x100   : > { %v416_v49 = vadd.f32 %v415_v39, %v414_v44  ;;  %v447_v55 = vadd.f32 %v446_v48, %v445_v50  ;;  %v454_v0 = vsel %vm407_vm2, %v440_v57, 0.0 }
 0x102   : > { %v418_v54 = vadd.f32 %v417_v46, %v416_v49  ;;  %v449_v60 = vadd.f32 %v448_v53, %v447_v55 }
 0x104   : > { %v420_v59 = vadd.f32 %v419_v51, %v418_v54  ;;  %v451_v63 = vadd.f32 %v450_v58, %v449_v60 }
 0x106   : > { %v422_v62 = vadd.f32 %v421_v56, %v420_v59  ;;  %v453_v2 = vadd.f32 %v452_v61, %v451_v63 }
 0x108   : > { %v423_v1 = vrot.slane %v422_v62, 4  ;;  %v455_v4 = vadd.f32 %v454_v0, %v453_v2 }
 0x10a   : > { %v424_v3 = vadd.f32 %v423_v1, %v422_v62  ;;  %v456_v6 = vrot.slane %v455_v4, 4 }
 0x10c   : > { %v425_v5 = vrot.slane %v424_v3, 2  ;;  %v457_v8 = vadd.f32 %v456_v6, %v455_v4 }
 0x10e   : > { %v426_v7 = vadd.f32 %v425_v5, %v424_v3  ;;  %v458_v10 = vrot.slane %v457_v8, 2 }
 0x110   : > { %v427_v9 = vrot.slane %v426_v7, 1  ;;  %v459_v13 = vadd.f32 %v458_v10, %v457_v8 }
 0x112   : > { %v428_v12 = vadd.f32 %v427_v9, %v426_v7  ;;  %v460_v15 = vrot.slane %v459_v13, 1 }
 0x114   : > { %v429_v14 = vadd.f32 %v428_v12, %v406_v11  ;;  %v461_v17 = vadd.f32 %v460_v15, %v459_v13 }
 0x116   : > { %431 = vst.msk [vmem:[%s782_s3] sm:$0x1] %vm430_vm3, %v429_v14  ;;  %v462_v18 = vadd.f32 %v461_v17, %v432_v16 }
 0x118   : > { %463 = vst.msk [vmem:[%s783_s4] sm:$0x1] %vm430_vm3, %v462_v18 }
 0x119 PF: > { %s15_s15 = sadd.s32 1, %s651_s15  }
 0x11a   : > { %p12_p5 = scmp.ge.s32.totalorder %s15_s15, 4  }
 0x11c   :  { %14 = sbr.rel (!%p12_p5) target bundleno = 1 (0x1), region = 78 }

// kernel: nlayer_discriminator_forward.10
= control target key start
LH: loop header
LB: loop body
LE: loop exit
PB: predicated region body
PF: predicated region fallthrough
CT: control target
= control target key end

     0   :  { %s425_s12 = smov 0   ;;  %s473_s0 = inlined_call_operand.vmem [shape: bf16[128,16], index: 0, kind: input, shape index: {}]   ;;  %s474_s1 = inlined_call_operand.vmem [shape: f32[1,16], index: 1, kind: input, shape index: {}]   ;;  %s475_s2 = inlined_call_operand.vmem [shape: f32[1,16], index: 2, kind: input, shape index: {}]   ;;  %s476_s3 = inlined_call_operand.vmem [shape: bf16[128,16], index: 3, kind: output, shape index: {}]  }
   0x1 LB: > { %s341_s13 = sadd.s32 4294967295, %s403_s12   ;;  %p345_p0 = scmp.ge.s32.totalorder %s403_s12, 1  ;;  %s403_s12 = sphi %s425_s12, %s13_s12  }
   0x2   : > { %p138_p1 = scmp.lt.s32.totalorder %s403_s12, 3 }
   0x4   : > { %p139_p2 = pnand %p345_p0, %p138_p1 }
   0x5   : > { %s346_s14 = sshll.u32 (!%p139_p2), %s341_s13, 3 }
   0x6   : > { %142 = sbr.rel (%p139_p2) target bundleno = 34 (0x22), region = 32  ;;  %p163_p3 = scmp.lt.s32.totalorder (!%p139_p2), %s346_s14, 15 }
   0xb   : > { %s478_s14 = smov (!%p163_p3, %s346_s14), 15  ;;  %v350_v0 = vld [vmem:[%s474_s1] ss:$0 sm:$0xff]  ;;  %vm276_vm0 = vcmask 125952  }
   0xc   : > { %s347_s15 = sshll.u32 %s478_s14, 2  ;;  %v351_v9 = vld [vmem:[%s475_s2] ss:$0 sm:$0xff] }
   0xd   : > { %s166_s18 = scalar_lea.vmem %s473_s0, %s347_s15  ;;  %s452_s25 = scalar_lea.vmem %s476_s3, %s347_s15 }
   0xe   : > { %v371_v1 = vld [vmem:[%s166_s18] sm:$0xff]   ;;  %v386_v2 = vld [vmem:[%s166_s18 + $0x8] sm:$0xff]   ;;  %v387_v3 = vld [vmem:[%s166_s18 + $0x10] sm:$0xff]  }
   0xf   : > { %v372_v4 = vunpack.c.l.bf16 %v371_v1  ;;  %v373_v5 = vunpack.c.h.bf16 %v371_v1  ;;  %v376_v6 = vunpack.c.l.bf16 %v386_v2  ;;  %v377_v7 = vunpack.c.h.bf16 %v386_v2  ;;  %v388_v8 = vld [vmem:[%s166_s18 + $0x18] sm:$0xff]  }
  0x10   : > { %v380_v10 = vunpack.c.l.bf16 %v387_v3  ;;  %v381_v11 = vunpack.c.h.bf16 %v387_v3  ;;  %v384_v12 = vunpack.c.l.bf16 %v388_v8  ;;  %v385_v13 = vunpack.c.h.bf16 %v388_v8 }
  0x11   : > { %v197_v14 = vmul.f32 %v372_v4, %v350_v0  ;;  %v198_v15 = vmul.f32 %v373_v5, %v350_v0  ;;  %v199_v16 = vmul.f32 %v376_v6, %v350_v0  ;;  %v200_v17 = vmul.f32 %v377_v7, %v350_v0 }
  0x12   : > { %v201_v18 = vmul.f32 %v380_v10, %v350_v0  ;;  %v202_v19 = vmul.f32 %v381_v11, %v350_v0  ;;  %v203_v20 = vmul.f32 %v384_v12, %v350_v0  ;;  %v204_v21 = vmul.f32 %v385_v13, %v350_v0 }
  0x13   : > { %v212_v22 = vadd.f32 %v351_v9, %v197_v14  ;;  %v213_v23 = vadd.f32 %v351_v9, %v198_v15  ;;  %v214_v24 = vadd.f32 %v351_v9, %v199_v16  ;;  %v215_v25 = vadd.f32 %v351_v9, %v200_v17 }
  0x14   : > { %v216_v26 = vadd.f32 %v351_v9, %v201_v18  ;;  %v217_v27 = vadd.f32 %v351_v9, %v202_v19  ;;  %v218_v28 = vadd.f32 %v351_v9, %v203_v20  ;;  %v219_v29 = vadd.f32 %v351_v9, %v204_v21 }
  0x15   : > { %vm220_vm1 = vcmp.ge.f32.partialorder %v212_v22, 0.0  ;;  %v228_v30 = vmul.f32 0.2, %v212_v22  ;;  %vm221_vm2 = vcmp.ge.f32.partialorder %v213_v23, 0.0  ;;  %v229_v31 = vmul.f32 0.2, %v213_v23 }
  0x16   : > { %vm222_vm3 = vcmp.ge.f32.partialorder %v214_v24, 0.0  ;;  %v230_v32 = vmul.f32 0.2, %v214_v24  ;;  %vm223_vm4 = vcmp.ge.f32.partialorder %v215_v25, 0.0  ;;  %v231_v33 = vmul.f32 0.2, %v215_v25 }
  0x17   : > { %v236_v34 = vsel %vm220_vm1, %v212_v22, %v228_v30  ;;  %v237_v35 = vsel %vm221_vm2, %v213_v23, %v229_v31  ;;  %vm224_vm5 = vcmp.ge.f32.partialorder %v216_v26, 0.0  ;;  %v232_v36 = vmul.f32 0.2, %v216_v26 }
  0x18   : > { %v362_v37 = vpack.c.bf16 %v236_v34, %v236_v34  ;;  %v363_v38 = vpack.c.bf16 %v237_v35, %v237_v35  ;;  %v238_v39 = vsel %vm222_vm3, %v214_v24, %v230_v32  ;;  %v239_v40 = vsel %vm223_vm4, %v215_v25, %v231_v33 }
  0x19   : > { %v364_v41 = vpack.c.bf16 %v238_v39, %v238_v39  ;;  %v365_v42 = vpack.c.bf16 %v239_v40, %v239_v40  ;;  %v240_v43 = vsel %vm224_vm5, %v216_v26, %v232_v36  ;;  %vm225_vm6 = vcmp.ge.f32.partialorder %v217_v27, 0.0 }
  0x1a   : > { %277 = vst.msk [vmem:[%s452_s25] sm:$0xf] %vm276_vm0, %v362_v37  ;;  %278 = vst.msk [vmem:[%s452_s25 + $0x4] sm:$0xf] %vm276_vm0, %v363_v38  ;;  %v366_v44 = vpack.c.bf16 %v240_v43, %v240_v43  ;;  %v233_v45 = vmul.f32 0.2, %v217_v27 }
  0x1b   : > { %vm226_vm7 = vcmp.ge.f32.partialorder %v218_v28, 0.0  ;;  %v234_v46 = vmul.f32 0.2, %v218_v28  ;;  %279 = vst.msk [vmem:[%s452_s25 + $0x8] sm:$0xf] %vm276_vm0, %v364_v41  ;;  %vm227_vm8 = vcmp.ge.f32.partialorder %v219_v29, 0.0 }
  0x1c   : > { %280 = vst.msk [vmem:[%s452_s25 + $0xc] sm:$0xf] %vm276_vm0, %v365_v42  ;;  %v235_v47 = vmul.f32 0.2, %v219_v29  ;;  %281 = vst.msk [vmem:[%s452_s25 + $0x10] sm:$0xf] %vm276_vm0, %v366_v44  ;;  %v241_v48 = vsel %vm225_vm6, %v217_v27, %v233_v45 }
  0x1d   : > { %v242_v49 = vsel %vm226_vm7, %v218_v28, %v234_v46  ;;  %v367_v50 = vpack.c.bf16 %v241_v48, %v241_v48 }
  0x1e   : > { %v368_v51 = vpack.c.bf16 %v242_v49, %v242_v49  ;;  %v243_v52 = vsel %vm227_vm8, %v219_v29, %v235_v47 }
  0x1f   : > { %v369_v53 = vpack.c.bf16 %v243_v52, %v243_v52  ;;  %282 = vst.msk [vmem:[%s452_s25 + $0x14] sm:$0xf] %vm276_vm0, %v367_v50 }
  0x20   : > { %283 = vst.msk [vmem:[%s452_s25 + $0x18] sm:$0xf] %vm276_vm0, %v368_v51 }
  0x21   : > { %284 = vst.msk [vmem:[%s452_s25 + $0x1c] sm:$0xf] %vm276_vm0, %v369_v53 }
  0x22 PF: > { %s13_s12 = sadd.s32 1, %s403_s12  }
  0x23   : > { %p10_p4 = scmp.ge.s32.totalorder %s13_s12, 4  }
  0x25   :  { %12 = sbr.rel (!%p10_p4) target bundleno = 1 (0x1), region = 62 }

// kernel: nlayer_discriminator_forward.11
= control target key start
LH: loop header
LB: loop body
LE: loop exit
PB: predicated region body
PF: predicated region fallthrough
CT: control target
= control target key end

     0   :  { %vm241_vm0 = vcmask 253952   ;;  %v389_v20 = vmov 0.0   ;;  %vm232_vm1 = vcmask 257024   ;;  %vm245_vm2 = vcmask 261120   ;;  %s521_s1 = inlined_call_operand.vmem [shape: bf16[256,32], index: 1, kind: input, shape index: {}]   ;;  %s522_s0 = inlined_call_operand.vmem [shape: bf16[32,256], index: 0, kind: input, shape index: {}]   ;;  %s523_s3 = inlined_call_operand.vmem [shape: f32[1,32], index: 3, kind: output, shape index: {1}]   ;;  %s524_s4 = inlined_call_operand.vmem [shape: f32[1,32], index: 4, kind: output, shape index: {2}]   ;;  %s525_s2 = inlined_call_operand.vmem [shape: bf16[32,32], index: 2, kind: output, shape index: {0}]  }
   0x1   :  { %v367_v0 = vld [vmem:[%s521_s1 + $0x78] sm:$0xff]   ;;  %v369_v2 = vld [vmem:[%s521_s1 + $0x70] sm:$0xff]   ;;  %v371_v4 = vld [vmem:[%s521_s1 + $0x68] sm:$0xff]   ;;  %242 = vst.msk [vmem:[%s523_s3] sm:$0x1] %vm241_vm0, %v389_v20 }
   0x2   :  { %v368_v1 = vld [vmem:[%s521_s1 + $0x38] sm:$0xff]   ;;  %322 = vmatprep.subr.bf16.mxu0 %v367_v0  ;;  %350 = vmatprep.subr.bf16.mxu1 %v367_v0  ;;  %v370_v3 = vld [vmem:[%s521_s1 + $0x30] sm:$0xff]   ;;  %v372_v5 = vld [vmem:[%s521_s1 + $0x28] sm:$0xff]   ;;  %243 = vst.msk [vmem:[%s524_s4] sm:$0x1] %vm241_vm0, %v389_v20 }
   0x3   :  { %323 = vmatpush3.bf16.msra.mxu0 %v368_v1  ;;  %358 = vmatpush3.bf16.msra.mxu1 %v368_v1  ;;  %v373_v6 = vld [vmem:[%s521_s1 + $0x60] sm:$0xff]   ;;  %v375_v8 = vld [vmem:[%s521_s1 + $0x58] sm:$0xff]   ;;  %v377_v10 = vld [vmem:[%s521_s1 + $0x50] sm:$0xff]  }
   0x4   :  { %324 = vmatprep.subr.bf16.mxu0 %v369_v2  ;;  %351 = vmatprep.subr.bf16.mxu1 %v369_v2  ;;  %v374_v7 = vld [vmem:[%s521_s1 + $0x20] sm:$0xff]   ;;  %v376_v9 = vld [vmem:[%s521_s1 + $0x18] sm:$0xff]   ;;  %v378_v13 = vld [vmem:[%s521_s1 + $0x10] sm:$0xff]  }
   0x5   :  { %v385_v11 = vld [vmem:[%s522_s0 + $0x4] ss:$8 sps:$4 sm:$0xff]   ;;  %v388_v12 = vld [vmem:[%s522_s0 + $0x14] ss:$8 sps:$4 sm:$0xff]   ;;  %v383_v18 = vld [vmem:[%s522_s0] ss:$8 sps:$4 sm:$0xff]  }
   0x6   :  { %v379_v14 = vld [vmem:[%s521_s1 + $0x48] sm:$0xff]   ;;  %199 = vmatprep.mubr.bf16.mxu0 %v385_v11  ;;  %207 = vmatprep.mubr.bf16.mxu1 %v388_v12  ;;  %v381_v16 = vld [vmem:[%s521_s1 + $0x40] sm:$0xff]   ;;  %v386_v19 = vld [vmem:[%s522_s0 + $0x10] ss:$8 sps:$4 sm:$0xff]  }
   0x7   :  { %325 = vmatpush3.bf16.msra.mxu0 %v370_v3  ;;  %359 = vmatpush3.bf16.msra.mxu1 %v370_v3  ;;  %v380_v15 = vld [vmem:[%s521_s1 + $0x8] sm:$0xff]   ;;  %v382_v17 = vld [vmem:[%s521_s1] sm:$0xff]  }
   0x8   :  { %326 = vmatprep.subr.bf16.mxu0 %v371_v4  ;;  %352 = vmatprep.subr.bf16.mxu1 %v371_v4  ;;  %v244_v0 = vld [vmem:[%s523_s3] sm:$0x1] }
   0x9   :  { %v262_v3 = vld [vmem:[%s524_s4] sm:$0x1] }
   0xb   :  { %327 = vmatpush3.bf16.msra.mxu0 %v372_v5  ;;  %360 = vmatpush3.bf16.msra.mxu1 %v372_v5 }
   0xc   :  { %328 = vmatprep.subr.bf16.mxu0 %v373_v6  ;;  %353 = vmatprep.subr.bf16.mxu1 %v373_v6 }
   0xf   :  { %329 = vmatpush3.bf16.msra.mxu0 %v374_v7  ;;  %361 = vmatpush3.bf16.msra.mxu1 %v374_v7 }
  0x10   :  { %330 = vmatprep.subr.bf16.mxu0 %v375_v8  ;;  %354 = vmatprep.subr.bf16.mxu1 %v375_v8 }
  0x13   :  { %331 = vmatpush3.bf16.msra.mxu0 %v376_v9  ;;  %362 = vmatpush3.bf16.msra.mxu1 %v376_v9 }
  0x14   :  { %332 = vmatprep.subr.bf16.mxu0 %v377_v10  ;;  %355 = vmatprep.subr.bf16.mxu1 %v377_v10 }
  0x17   :  { %333 = vmatpush3.bf16.msra.mxu0 %v378_v13  ;;  %363 = vmatpush3.bf16.msra.mxu1 %v378_v13 }
  0x18   :  { %334 = vmatprep.subr.bf16.mxu0 %v379_v14  ;;  %356 = vmatprep.subr.bf16.mxu1 %v379_v14 }
  0x1b   :  { %335 = vmatpush3.bf16.msra.mxu0 %v380_v15  ;;  %364 = vmatpush3.bf16.msra.mxu1 %v380_v15 }
  0x1c   :  { %336 = vmatprep.subr.bf16.mxu0 %v381_v16  ;;  %357 = vmatprep.subr.bf16.mxu1 %v381_v16 }
  0x1f   :  { %337 = vmatpush3.bf16.msra.mxu0 %v382_v17  ;;  %365 = vmatpush3.bf16.msra.mxu1 %v382_v17 }
  0x22   :  { %200 = vmatmul.mubr.bf16.vlgmr.msra.gmra.mxu0 %v383_v18  ;;  %208 = vmatmul.mubr.bf16.vlgmr.msra.gmra.mxu1 %v386_v19 }
  0xe2   :  { %v338_v21 = vpop.f32.mrf.mxu0  ;;  %v344_v22 = vpop.f32.mrf.mxu1 }
  0xe4   :  { %v339_v23 = vpop.f32.mrf.mxu0  ;;  %v345_v24 = vpop.f32.mrf.mxu1 }
  0xe5   :  { %v340_v25 = vadd.f32 %v339_v23, %v338_v21  ;;  %v346_v26 = vadd.f32 %v345_v24, %v344_v22 }
  0xe6   :  { %v341_v27 = vpop.f32.mrf.mxu0  ;;  %v347_v28 = vpop.f32.mrf.mxu1 }
  0xe7   :  { %v318_v29 = vpack.c.bf16 %v340_v25, %v340_v25  ;;  %v320_v30 = vpack.c.bf16 %v346_v26, %v346_v26  ;;  %v263_v33 = vmul.f32 %v340_v25, %v340_v25  ;;  %v246_v36 = vsel %vm245_vm2, %v340_v25, 0.0 }
  0xe8   :  { %v342_v31 = vpop.f32.mrf.mxu0  ;;  %v348_v32 = vpop.f32.mrf.mxu1  ;;  %v265_v37 = vmul.f32 %v346_v26, %v346_v26  ;;  %v249_v44 = vsel %vm245_vm2, %v346_v26, 0.0 }
  0xe9   :  { %233 = vst.msk [vmem:[%s525_s2] sm:$0xf] %vm232_vm1, %v318_v29  ;;  %235 = vst.msk [vmem:[%s525_s2 + $0x8] sm:$0xf] %vm232_vm1, %v320_v30  ;;  %v343_v34 = vadd.f32 %v342_v31, %v341_v27  ;;  %v349_v35 = vadd.f32 %v348_v32, %v347_v28  ;;  %v267_v43 = vsel %vm245_vm2, %v263_v33, 0.0 }
  0xea   :  { %v270_v49 = vsel %vm245_vm2, %v265_v37, 0.0 }
  0xeb   :  { %v319_v38 = vpack.c.bf16 %v343_v34, %v343_v34  ;;  %v247_v39 = vsel %vm245_vm2, %v343_v34, 0.0  ;;  %v264_v40 = vmul.f32 %v343_v34, %v343_v34  ;;  %v321_v41 = vpack.c.bf16 %v349_v35, %v349_v35 }
  0xec   :  { %v248_v42 = vadd.f32 %v247_v39, %v246_v36  ;;  %v266_v46 = vmul.f32 %v349_v35, %v349_v35  ;;  %v251_v50 = vsel %vm245_vm2, %v349_v35, 0.0 }
  0xed   :  { %234 = vst.msk [vmem:[%s525_s2 + $0x4] sm:$0xf] %vm232_vm1, %v319_v38  ;;  %v268_v45 = vsel %vm245_vm2, %v264_v40, 0.0  ;;  %236 = vst.msk [vmem:[%s525_s2 + $0xc] sm:$0xf] %vm232_vm1, %v321_v41 }
  0xee   :  { %v269_v47 = vadd.f32 %v268_v45, %v267_v43  ;;  %v250_v48 = vadd.f32 %v249_v44, %v248_v42  ;;  %v272_v53 = vsel %vm245_vm2, %v266_v46, 0.0 }
  0xf0   :  { %v252_v51 = vadd.f32 %v251_v50, %v250_v48  ;;  %v271_v52 = vadd.f32 %v270_v49, %v269_v47 }
  0xf2   :  { %v253_v54 = vrot.slane %v252_v51, 4  ;;  %v273_v55 = vadd.f32 %v272_v53, %v271_v52 }
  0xf4   :  { %v254_v56 = vadd.f32 %v253_v54, %v252_v51  ;;  %v274_v57 = vrot.slane %v273_v55, 4 }
  0xf6   :  { %v255_v58 = vrot.slane %v254_v56, 2  ;;  %v275_v59 = vadd.f32 %v274_v57, %v273_v55 }
  0xf8   :  { %v256_v60 = vadd.f32 %v255_v58, %v254_v56  ;;  %v276_v61 = vrot.slane %v275_v59, 2 }
  0xfa   :  { %v257_v62 = vrot.slane %v256_v60, 1  ;;  %v277_v63 = vadd.f32 %v276_v61, %v275_v59 }
  0xfc   :  { %v258_v1 = vadd.f32 %v257_v62, %v256_v60  ;;  %v278_v2 = vrot.slane %v277_v63, 1 }
  0xfe   :  { %v259_v4 = vadd.f32 %v258_v1, %v244_v0  ;;  %v279_v5 = vadd.f32 %v278_v2, %v277_v63 }
 0x100   :  { %261 = vst.msk [vmem:[%s523_s3] sm:$0x1] %vm241_vm0, %v259_v4  ;;  %v280_v6 = vadd.f32 %v279_v5, %v262_v3 }
 0x102   :  { %281 = vst.msk [vmem:[%s524_s4] sm:$0x1] %vm241_vm0, %v280_v6 }

// kernel: nlayer_discriminator_forward.12
= control target key start
LH: loop header
LB: loop body
LE: loop exit
PB: predicated region body
PF: predicated region fallthrough
CT: control target
= control target key end

     0   :  { %vm72_vm4 = vcmask 257024   ;;  %s144_s0 = inlined_call_operand.vmem [shape: bf16[32,32], index: 0, kind: input, shape index: {}]   ;;  %s145_s1 = inlined_call_operand.vmem [shape: f32[1,32], index: 1, kind: input, shape index: {}]   ;;  %s146_s2 = inlined_call_operand.vmem [shape: f32[1,32], index: 2, kind: input, shape index: {}]   ;;  %s147_s3 = inlined_call_operand.vmem [shape: bf16[32,32], index: 3, kind: output, shape index: {}]  }
   0x1   :  { %v92_v0 = vld [vmem:[%s144_s0] sm:$0xff]   ;;  %v99_v4 = vld [vmem:[%s144_s0 + $0x8] sm:$0xff]  }
   0x2   :  { %v81_v1 = vld [vmem:[%s145_s1] ss:$0 sm:$0xff]  ;;  %v93_v2 = vunpack.c.l.bf16 %v92_v0  ;;  %v94_v3 = vunpack.c.h.bf16 %v92_v0  ;;  %v97_v6 = vunpack.c.l.bf16 %v99_v4  ;;  %v98_v7 = vunpack.c.h.bf16 %v99_v4 }
   0x3   :  { %v82_v5 = vld [vmem:[%s146_s2] ss:$0 sm:$0xff] }
   0x4   :  { %v29_v8 = vmul.f32 %v93_v2, %v81_v1  ;;  %v30_v9 = vmul.f32 %v94_v3, %v81_v1  ;;  %v31_v10 = vmul.f32 %v97_v6, %v81_v1  ;;  %v32_v11 = vmul.f32 %v98_v7, %v81_v1 }
   0x6   :  { %v40_v12 = vadd.f32 %v82_v5, %v29_v8  ;;  %v41_v13 = vadd.f32 %v82_v5, %v30_v9  ;;  %v42_v14 = vadd.f32 %v82_v5, %v31_v10  ;;  %v43_v15 = vadd.f32 %v82_v5, %v32_v11 }
   0x8   :  { %vm44_vm0 = vcmp.ge.f32.partialorder %v40_v12, 0.0  ;;  %v48_v16 = vmul.f32 0.2, %v40_v12  ;;  %vm45_vm1 = vcmp.ge.f32.partialorder %v41_v13, 0.0  ;;  %v49_v17 = vmul.f32 0.2, %v41_v13 }
   0x9   :  { %vm46_vm2 = vcmp.ge.f32.partialorder %v42_v14, 0.0  ;;  %v50_v18 = vmul.f32 0.2, %v42_v14  ;;  %vm47_vm3 = vcmp.ge.f32.partialorder %v43_v15, 0.0  ;;  %v51_v19 = vmul.f32 0.2, %v43_v15 }
   0xa   :  { %v52_v20 = vsel %vm44_vm0, %v40_v12, %v48_v16  ;;  %v53_v21 = vsel %vm45_vm1, %v41_v13, %v49_v17 }
   0xb   :  { %v87_v22 = vpack.c.bf16 %v52_v20, %v52_v20  ;;  %v88_v23 = vpack.c.bf16 %v53_v21, %v53_v21  ;;  %v54_v24 = vsel %vm46_vm2, %v42_v14, %v50_v18  ;;  %v55_v25 = vsel %vm47_vm3, %v43_v15, %v51_v19 }
   0xc   :  { %v89_v26 = vpack.c.bf16 %v54_v24, %v54_v24  ;;  %v90_v27 = vpack.c.bf16 %v55_v25, %v55_v25 }
   0xd   :  { %73 = vst.msk [vmem:[%s147_s3] sm:$0xf] %vm72_vm4, %v87_v22  ;;  %74 = vst.msk [vmem:[%s147_s3 + $0x4] sm:$0xf] %vm72_vm4, %v88_v23 }
   0xe   :  { %75 = vst.msk [vmem:[%s147_s3 + $0x8] sm:$0xf] %vm72_vm4, %v89_v26  ;;  %76 = vst.msk [vmem:[%s147_s3 + $0xc] sm:$0xf] %vm72_vm4, %v90_v27 }

// kernel: nlayer_discriminator_forward.14
= control target key start
LH: loop header
LB: loop body
LE: loop exit
PB: predicated region body
PF: predicated region fallthrough
CT: control target
= control target key end

     0   :  { %vm62_vm3 = vcmask 519168   ;;  %vm65_vm4 = vcmask 516096   ;;  %s124_s0 = inlined_call_operand.vmem [shape: bf16[18,64], index: 0, kind: input, shape index: {}]   ;;  %s125_s1 = inlined_call_operand.vmem [shape: f32[1,64], index: 1, kind: input, shape index: {}]   ;;  %s126_s2 = inlined_call_operand.vmem [shape: f32[1,64], index: 2, kind: input, shape index: {}]   ;;  %s127_s3 = inlined_call_operand.vmem [shape: bf16[18,64], index: 3, kind: output, shape index: {}]  }
   0x1   :  { %v80_v0 = vld [vmem:[%s124_s0] sm:$0xff]   ;;  %v16_v4 = vld [vmem:[%s124_s0 + $0x8] sm:$0x1] }
   0x2   :  { %v71_v1 = vld [vmem:[%s125_s1] ss:$0 sm:$0xff]  ;;  %v81_v2 = vunpack.c.l.bf16 %v80_v0  ;;  %v82_v3 = vunpack.c.h.bf16 %v80_v0  ;;  %v19_v6 = vunpack.c.l.bf16 %v16_v4 }
   0x3   :  { %v72_v5 = vld [vmem:[%s126_s2] ss:$0 sm:$0xff] }
   0x4   :  { %v27_v7 = vmul.f32 %v81_v2, %v71_v1  ;;  %v28_v8 = vmul.f32 %v82_v3, %v71_v1  ;;  %v29_v9 = vmul.f32 %v71_v1, %v19_v6 }
   0x6   :  { %v37_v10 = vadd.f32 %v72_v5, %v27_v7  ;;  %v38_v11 = vadd.f32 %v72_v5, %v28_v8  ;;  %v39_v12 = vadd.f32 %v72_v5, %v29_v9 }
   0x8   :  { %vm40_vm0 = vcmp.ge.f32.partialorder %v37_v10, 0.0  ;;  %v43_v13 = vmul.f32 0.2, %v37_v10  ;;  %vm41_vm1 = vcmp.ge.f32.partialorder %v38_v11, 0.0  ;;  %v44_v14 = vmul.f32 0.2, %v38_v11 }
   0x9   :  { %vm42_vm2 = vcmp.ge.f32.partialorder %v39_v12, 0.0  ;;  %v45_v15 = vmul.f32 0.2, %v39_v12 }
   0xa   :  { %v46_v16 = vsel %vm40_vm0, %v37_v10, %v43_v13  ;;  %v47_v17 = vsel %vm41_vm1, %v38_v11, %v44_v14 }
   0xb   :  { %v76_v18 = vpack.c.bf16 %v46_v16, %v46_v16  ;;  %v77_v19 = vpack.c.bf16 %v47_v17, %v47_v17  ;;  %v48_v20 = vsel %vm42_vm2, %v39_v12, %v45_v15 }
   0xc   :  { %v78_v21 = vpack.c.bf16 %v48_v20, %v48_v20 }
   0xd   :  { %63 = vst.msk [vmem:[%s127_s3] sm:$0xf] %vm62_vm3, %v76_v18  ;;  %64 = vst.msk [vmem:[%s127_s3 + $0x4] sm:$0xf] %vm62_vm3, %v77_v19 }
   0xe   :  { %66 = vst.msk [vmem:[%s127_s3 + $0x8] sm:$0x1] %vm65_vm4, %v78_v21 }

// kernel: nlayer_discriminator_forward.13
= control target key start
LH: loop header
LB: loop body
LE: loop exit
PB: predicated region body
PF: predicated region fallthrough
CT: control target
= control target key end

     0   :  { %vm423_vm0 = vcmask 516096   ;;  %v621_v42 = vmov 0.0   ;;  %vm420_vm1 = vcmask 519168   ;;  %vm432_vm2 = vcmask 523264   ;;  %s801_s1 = inlined_call_operand.vmem [shape: bf16[512,64], index: 1, kind: input, shape index: {}]   ;;  %s802_s0 = inlined_call_operand.vmem [shape: bf16[18,512], index: 0, kind: input, shape index: {}]   ;;  %s803_s3 = inlined_call_operand.vmem [shape: f32[1,64], index: 3, kind: output, shape index: {1}]   ;;  %s804_s4 = inlined_call_operand.vmem [shape: f32[1,64], index: 4, kind: output, shape index: {2}]   ;;  %s805_s2 = inlined_call_operand.vmem [shape: bf16[18,64], index: 2, kind: output, shape index: {0}]  }
   0x1   :  { %v579_v0 = vld [vmem:[%s801_s1 + $0x78] sm:$0xff]   ;;  %v583_v4 = vld [vmem:[%s801_s1 + $0x70] sm:$0xff]   ;;  %v587_v8 = vld [vmem:[%s801_s1 + $0x68] sm:$0xff]   ;;  %429 = vst.msk [vmem:[%s803_s3] sm:$0x1] %vm423_vm0, %v621_v42  ;;  %vm436_vm3 = vcmask 517120  }
   0x2   :  { %v580_v1 = vld [vmem:[%s801_s1 + $0xf8] sm:$0xff]   ;;  %522 = vmatprep.subr.bf16.mxu0 %v579_v0  ;;  %v584_v5 = vld [vmem:[%s801_s1 + $0xf0] sm:$0xff]   ;;  %v588_v9 = vld [vmem:[%s801_s1 + $0xe8] sm:$0xff]   ;;  %430 = vst.msk [vmem:[%s804_s4] sm:$0x1] %vm423_vm0, %v621_v42 }
   0x3   :  { %v581_v2 = vld [vmem:[%s801_s1 + $0x38] sm:$0xff]   ;;  %550 = vmatprep.subr.bf16.mxu1 %v580_v1  ;;  %v585_v6 = vld [vmem:[%s801_s1 + $0x30] sm:$0xff]   ;;  %v589_v10 = vld [vmem:[%s801_s1 + $0x28] sm:$0xff]  }
   0x4   :  { %v582_v3 = vld [vmem:[%s801_s1 + $0xb8] sm:$0xff]   ;;  %523 = vmatpush3.bf16.msra.mxu0 %v581_v2  ;;  %v586_v7 = vld [vmem:[%s801_s1 + $0xb0] sm:$0xff]   ;;  %v590_v11 = vld [vmem:[%s801_s1 + $0xa8] sm:$0xff]  }
   0x5   :  { %551 = vmatpush3.bf16.msra.mxu1 %v582_v3  ;;  %524 = vmatprep.subr.bf16.mxu0 %v583_v4  ;;  %v591_v12 = vld [vmem:[%s801_s1 + $0x60] sm:$0xff]   ;;  %v595_v16 = vld [vmem:[%s801_s1 + $0x58] sm:$0xff]   ;;  %v599_v20 = vld [vmem:[%s801_s1 + $0x50] sm:$0xff]  }
   0x6   :  { %552 = vmatprep.subr.bf16.mxu1 %v584_v5  ;;  %v592_v13 = vld [vmem:[%s801_s1 + $0xe0] sm:$0xff]   ;;  %v596_v17 = vld [vmem:[%s801_s1 + $0xd8] sm:$0xff]   ;;  %v600_v21 = vld [vmem:[%s801_s1 + $0xd0] sm:$0xff]  }
   0x7   :  { %v593_v14 = vld [vmem:[%s801_s1 + $0x20] sm:$0xff]   ;;  %v597_v18 = vld [vmem:[%s801_s1 + $0x18] sm:$0xff]   ;;  %v601_v22 = vld [vmem:[%s801_s1 + $0x10] sm:$0xff]  }
   0x8   :  { %525 = vmatpush3.bf16.msra.mxu0 %v585_v6  ;;  %v594_v15 = vld [vmem:[%s801_s1 + $0xa0] sm:$0xff]   ;;  %v598_v19 = vld [vmem:[%s801_s1 + $0x98] sm:$0xff]   ;;  %v602_v23 = vld [vmem:[%s801_s1 + $0x90] sm:$0xff]  }
   0x9   :  { %553 = vmatpush3.bf16.msra.mxu1 %v586_v7  ;;  %526 = vmatprep.subr.bf16.mxu0 %v587_v8  ;;  %v603_v24 = vld [vmem:[%s801_s1 + $0x48] sm:$0xff]   ;;  %v607_v28 = vld [vmem:[%s801_s1 + $0x40] sm:$0xff]  }
   0xa   :  { %554 = vmatprep.subr.bf16.mxu1 %v588_v9  ;;  %v604_v25 = vld [vmem:[%s801_s1 + $0xc8] sm:$0xff]   ;;  %v608_v29 = vld [vmem:[%s801_s1 + $0xc0] sm:$0xff]  }
   0xb   :  { %v605_v26 = vld [vmem:[%s801_s1 + $0x8] sm:$0xff]   ;;  %v609_v30 = vld [vmem:[%s801_s1] sm:$0xff]  }
   0xc   :  { %527 = vmatpush3.bf16.msra.mxu0 %v589_v10  ;;  %v606_v27 = vld [vmem:[%s801_s1 + $0x88] sm:$0xff]   ;;  %v610_v31 = vld [vmem:[%s801_s1 + $0x80] sm:$0xff]  }
   0xd   :  { %555 = vmatpush3.bf16.msra.mxu1 %v590_v11  ;;  %528 = vmatprep.subr.bf16.mxu0 %v591_v12  ;;  %v611_v32 = vld [vmem:[%s802_s0] ss:$16 sps:$4 sm:$0xff]   ;;  %v613_v33 = vld [vmem:[%s802_s0 + $0x4] ss:$16 sps:$4 sm:$0xff]   ;;  %v614_v34 = vld [vmem:[%s802_s0 + $0x8] ss:$16 sps:$4 sm:$0xff]  }
   0xe   :  { %556 = vmatprep.subr.bf16.mxu1 %v592_v13  ;;  %v616_v35 = vld [vmem:[%s802_s0 + $0xc] ss:$16 sps:$4 sm:$0xff]   ;;  %v19_v36 = vld [vmem:[%s802_s0 + $0x20] sm:$0x11]  ;;  %343 = vmatprep.mubr.bf16.mxu0 %v613_v33 }
   0xf   :  { %v481_v37 = vcombine.high %v19_v36, %v19_v36  ;;  %v20_v38 = vld [vmem:[%s802_s0 + $0x28] sm:$0x11]  ;;  %391 = vmatprep.mubr.bf16.mxu1 %v616_v35  ;;  %v480_v40 = vcombine.low %v19_v36, %v19_v36 }
  0x10   :  { %529 = vmatpush3.bf16.msra.mxu0 %v593_v14  ;;  %v483_v39 = vcombine.high %v20_v38, %v20_v38  ;;  %v482_v41 = vcombine.low %v20_v38, %v20_v38 }
  0x11   :  { %557 = vmatpush3.bf16.msra.mxu1 %v594_v15  ;;  %530 = vmatprep.subr.bf16.mxu0 %v595_v16 }
  0x12   :  { %558 = vmatprep.subr.bf16.mxu1 %v596_v17 }
  0x14   :  { %531 = vmatpush3.bf16.msra.mxu0 %v597_v18 }
  0x15   :  { %559 = vmatpush3.bf16.msra.mxu1 %v598_v19  ;;  %532 = vmatprep.subr.bf16.mxu0 %v599_v20 }
  0x16   :  { %560 = vmatprep.subr.bf16.mxu1 %v600_v21 }
  0x18   :  { %533 = vmatpush3.bf16.msra.mxu0 %v601_v22 }
  0x19   :  { %561 = vmatpush3.bf16.msra.mxu1 %v602_v23  ;;  %534 = vmatprep.subr.bf16.mxu0 %v603_v24 }
  0x1a   :  { %562 = vmatprep.subr.bf16.mxu1 %v604_v25 }
  0x1c   :  { %535 = vmatpush3.bf16.msra.mxu0 %v605_v26 }
  0x1d   :  { %563 = vmatpush3.bf16.msra.mxu1 %v606_v27  ;;  %536 = vmatprep.subr.bf16.mxu0 %v607_v28 }
  0x1e   :  { %564 = vmatprep.subr.bf16.mxu1 %v608_v29  ;;  %v431_v29 = vld [vmem:[%s803_s3] sm:$0x1] }
  0x20   :  { %537 = vmatpush3.bf16.msra.mxu0 %v609_v30 }
  0x21   :  { %565 = vmatpush3.bf16.msra.mxu1 %v610_v31 }
  0x23   :  { %344 = vmatmul.mubr.bf16.vlgmr.msra.gmra.mxu0 %v611_v32  ;;  %v447_v32 = vld [vmem:[%s804_s4] sm:$0x1] }
  0x24   :  { %392 = vmatmul.mubr.bf16.vlgmr.msra.gmra.mxu1 %v614_v34  ;;  %351 = vmatprep.mubr.bf16.mxu0 %v481_v37 }
  0x25   :  { %399 = vmatprep.mubr.bf16.mxu1 %v483_v39 }
  0x2b   :  { %352 = vmatmul.mubr.bf16.gmra.mxu0 %v480_v40 }
  0x2c   :  { %400 = vmatmul.mubr.bf16.gmra.mxu1 %v482_v41 }
  0xe3   :  { %v538_v43 = vpop.f32.mrf.mxu0 }
  0xe4   :  { %v566_v44 = vpop.f32.mrf.mxu1 }
  0xe5   :  { %v539_v45 = vpop.f32.mrf.mxu0 }
  0xe6   :  { %v540_v46 = vadd.f32 %v539_v45, %v538_v43  ;;  %v567_v47 = vpop.f32.mrf.mxu1 }
  0xe7   :  { %v568_v48 = vadd.f32 %v567_v47, %v566_v44  ;;  %v541_v49 = vpop.f32.mrf.mxu0 }
  0xe8   :  { %v569_v50 = vpop.f32.mrf.mxu1 }
  0xe9   :  { %v394_v51 = vadd.f32 %v568_v48, %v540_v46  ;;  %v542_v52 = vpop.f32.mrf.mxu0 }
  0xea   :  { %v543_v53 = vadd.f32 %v542_v52, %v541_v49  ;;  %v570_v54 = vpop.f32.mrf.mxu1 }
  0xeb   :  { %v519_v55 = vpack.c.bf16 %v394_v51, %v394_v51  ;;  %v571_v56 = vadd.f32 %v570_v54, %v569_v50  ;;  %v544_v57 = vpop.f32.mrf.mxu0  ;;  %v448_v61 = vmul.f32 %v394_v51, %v394_v51  ;;  %v433_v6 = vsel %vm432_vm2, %v394_v51, 0.0 }
  0xec   :  { %v572_v58 = vpop.f32.mrf.mxu1 }
  0xed   :  { %421 = vst.msk [vmem:[%s805_s2] sm:$0xf] %vm420_vm1, %v519_v55  ;;  %v397_v59 = vadd.f32 %v571_v56, %v543_v53  ;;  %v545_v60 = vpop.f32.mrf.mxu0  ;;  %v451_v12 = vsel %vm432_vm2, %v448_v61, 0.0 }
  0xee   :  { %v546_v62 = vadd.f32 %v545_v60, %v544_v57  ;;  %v573_v63 = vpop.f32.mrf.mxu1 }
  0xef   :  { %v520_v0 = vpack.c.bf16 %v397_v59, %v397_v59  ;;  %v434_v1 = vsel %vm432_vm2, %v397_v59, 0.0  ;;  %v449_v2 = vmul.f32 %v397_v59, %v397_v59  ;;  %v574_v3 = vadd.f32 %v573_v63, %v572_v58  ;;  %v547_v4 = vpop.f32.mrf.mxu0 }
  0xf0   :  { %v575_v5 = vpop.f32.mrf.mxu1  ;;  %v435_v10 = vadd.f32 %v434_v1, %v433_v6 }
  0xf1   :  { %422 = vst.msk [vmem:[%s805_s2 + $0x4] sm:$0xf] %vm420_vm1, %v520_v0  ;;  %v452_v7 = vsel %vm432_vm2, %v449_v2, 0.0  ;;  %v402_v8 = vadd.f32 %v574_v3, %v546_v62  ;;  %v548_v9 = vpop.f32.mrf.mxu0 }
  0xf2   :  { %v576_v11 = vpop.f32.mrf.mxu1  ;;  %v453_v16 = vadd.f32 %v452_v7, %v451_v12 }
  0xf3   :  { %v521_v13 = vpack.c.bf16 %v402_v8, %v402_v8  ;;  %v437_v14 = vsel %vm436_vm3, %v402_v8, 0.0  ;;  %v450_v15 = vmul.f32 %v402_v8, %v402_v8 }
  0xf4   :  { %v438_v17 = vadd.f32 %v437_v14, %v435_v10 }
  0xf5   :  { %424 = vst.msk [vmem:[%s805_s2 + $0x8] sm:$0x1] %vm423_vm0, %v521_v13  ;;  %v454_v18 = vsel %vm436_vm3, %v450_v15, 0.0 }
  0xf6   :  { %v439_v19 = vrot.slane %v438_v17, 4  ;;  %v455_v20 = vadd.f32 %v454_v18, %v453_v16 }
  0xf8   :  { %v440_v21 = vadd.f32 %v439_v19, %v438_v17  ;;  %v456_v22 = vrot.slane %v455_v20, 4 }
  0xfa   :  { %v441_v23 = vrot.slane %v440_v21, 2  ;;  %v457_v24 = vadd.f32 %v456_v22, %v455_v20 }
  0xfc   :  { %v442_v25 = vadd.f32 %v441_v23, %v440_v21  ;;  %v458_v26 = vrot.slane %v457_v24, 2 }
  0xfe   :  { %v443_v27 = vrot.slane %v442_v25, 1  ;;  %v459_v28 = vadd.f32 %v458_v26, %v457_v24 }
 0x100   :  { %v444_v30 = vadd.f32 %v443_v27, %v442_v25  ;;  %v460_v31 = vrot.slane %v459_v28, 1 }
 0x102   :  { %v445_v33 = vadd.f32 %v444_v30, %v431_v29  ;;  %v461_v34 = vadd.f32 %v460_v31, %v459_v28 }
 0x104   :  { %446 = vst.msk [vmem:[%s803_s3] sm:$0x1] %vm423_vm0, %v445_v33  ;;  %v462_v35 = vadd.f32 %v461_v34, %v447_v32 }
 0x106   :  { %463 = vst.msk [vmem:[%s804_s4] sm:$0x1] %vm423_vm0, %v462_v35 }

// kernel: nlayer_discriminator_forward.15
= control target key start
LH: loop header
LB: loop body
LE: loop exit
PB: predicated region body
PF: predicated region fallthrough
CT: control target
= control target key end

     0   :  { %v984_v1 = vmov 0   ;;  %v152_v24 = vlaneseq  ;;  %v985_v25 = vmov 1966171168   ;;  %vm758_vm0 = vcmask 57344   ;;  %s1224_s0 = inlined_call_operand.vmem [shape: bf16[1024,8], index: 0, kind: input, shape index: {}]   ;;  %s1225_s2 = inlined_call_operand.<no memory space> [shape: f32[1,1], index: 2, kind: input, shape index: {}]   ;;  %s1226_s1 = inlined_call_operand.vmem [shape: bf16[1,1024], index: 1, kind: input, shape index: {}]   ;;  %s1227_s3 = inlined_call_operand.vmem [shape: f32[1,8], index: 3, kind: output, shape index: {}]  }
   0x1   :  { %v919_v0 = vld [vmem:[%s1224_s0 + $0x78] sm:$0xff]   ;;  %918 = vset.pattern.permute.xlu0 %v984_v1  ;;  %v8_v2 = vstv %s1225_s2  ;;  %v923_v6 = vld [vmem:[%s1224_s0 + $0x70] sm:$0xff]   ;;  %v927_v10 = vld [vmem:[%s1224_s0 + $0x68] sm:$0xff]   ;;  %v159_v26 = vunpack.c.l.s4 %v985_v25 }
   0x2   :  { %v920_v3 = vld [vmem:[%s1224_s0 + $0xf8] sm:$0xff]   ;;  %9 = vst [vmem:[#allocation2] sm:$0x1] %v8_v2  ;;  %828 = vmatprep.subr.bf16.mxu0 %v919_v0  ;;  %v924_v7 = vld [vmem:[%s1224_s0 + $0xf0] sm:$0xff]   ;;  %v928_v11 = vld [vmem:[%s1224_s0 + $0xe8] sm:$0xff]   ;;  %v1087_v31 = vshrl.u32 %v152_v24, 7 }
   0x3   :  { %v921_v4 = vld [vmem:[%s1224_s0 + $0x38] sm:$0xff]   ;;  %850 = vmatprep.subr.bf16.mxu1 %v920_v3  ;;  %v925_v8 = vld [vmem:[%s1224_s0 + $0x30] sm:$0xff]   ;;  %v929_v12 = vld [vmem:[%s1224_s0 + $0x28] sm:$0xff]   ;;  %v160_v32 = vunpack.c.0.s8 %v159_v26 }
   0x4   :  { %v922_v5 = vld [vmem:[%s1224_s0 + $0xb8] sm:$0xff]   ;;  %829 = vmatpush3.bf16.msra.mxu0 %v921_v4  ;;  %v926_v9 = vld [vmem:[%s1224_s0 + $0xb0] sm:$0xff]   ;;  %v930_v13 = vld [vmem:[%s1224_s0 + $0xa8] sm:$0xff]  }
   0x5   :  { %851 = vmatpush3.bf16.msra.mxu1 %v922_v5  ;;  %830 = vmatprep.subr.bf16.mxu0 %v923_v6  ;;  %v931_v14 = vld [vmem:[%s1224_s0 + $0x60] sm:$0xff]   ;;  %v935_v18 = vld [vmem:[%s1224_s0 + $0x58] sm:$0xff]   ;;  %v939_v22 = vld [vmem:[%s1224_s0 + $0x50] sm:$0xff]   ;;  %v1102_v37 = vsub.s32 %v160_v32, %v1087_v31  ;;  %v154_v32 = vsub.s32 0, %v1087_v31 }
   0x6   :  { %852 = vmatprep.subr.bf16.mxu1 %v924_v7  ;;  %v932_v15 = vld [vmem:[%s1224_s0 + $0xe0] sm:$0xff]   ;;  %v936_v19 = vld [vmem:[%s1224_s0 + $0xd8] sm:$0xff]   ;;  %v940_v23 = vld [vmem:[%s1224_s0 + $0xd0] sm:$0xff]  }
   0x7   :  { %v933_v16 = vld [vmem:[%s1224_s0 + $0x20] sm:$0xff]   ;;  %v937_v20 = vld [vmem:[%s1224_s0 + $0x18] sm:$0xff]   ;;  %v941_v27 = vld [vmem:[%s1224_s0 + $0x10] sm:$0xff]  }
   0x8   :  { %831 = vmatpush3.bf16.msra.mxu0 %v925_v8  ;;  %v934_v17 = vld [vmem:[%s1224_s0 + $0xa0] sm:$0xff]   ;;  %v938_v21 = vld [vmem:[%s1224_s0 + $0x98] sm:$0xff]   ;;  %v942_v28 = vld [vmem:[%s1224_s0 + $0x90] sm:$0xff]  }
   0x9   :  { %853 = vmatpush3.bf16.msra.mxu1 %v926_v9  ;;  %832 = vmatprep.subr.bf16.mxu0 %v927_v10  ;;  %v943_v29 = vld [vmem:[%s1224_s0 + $0x48] sm:$0xff]   ;;  %v947_v35 = vld [vmem:[%s1224_s0 + $0x40] sm:$0xff]   ;;  %v952_v43 = vld [vmem:[%s1224_s0 + $0x178] sm:$0xff]  }
   0xa   :  { %854 = vmatprep.subr.bf16.mxu1 %v928_v11  ;;  %v944_v30 = vld [vmem:[%s1224_s0 + $0xc8] sm:$0xff]   ;;  %v948_v36 = vld [vmem:[%s1224_s0 + $0xc0] sm:$0xff]   ;;  %v953_v44 = vld [vmem:[%s1224_s0 + $0x1f8] sm:$0xff]  }
   0xb   :  { %v945_v33 = vld [vmem:[%s1224_s0 + $0x8] sm:$0xff]   ;;  %v949_v38 = vld [vmem:[%s1224_s0] sm:$0xff]   ;;  %v954_v49 = vld [vmem:[%s1224_s0 + $0x138] sm:$0xff]  }
   0xc   :  { %833 = vmatpush3.bf16.msra.mxu0 %v929_v12  ;;  %v946_v34 = vld [vmem:[%s1224_s0 + $0x88] sm:$0xff]   ;;  %v950_v39 = vld [vmem:[%s1224_s0 + $0x80] sm:$0xff]   ;;  %v956_v52 = vld [vmem:[%s1224_s0 + $0x170] sm:$0xff]  }
   0xd   :  { %855 = vmatpush3.bf16.msra.mxu1 %v930_v13  ;;  %834 = vmatprep.subr.bf16.mxu0 %v931_v14  ;;  %v17_v40 = vld [vmem:[%s1226_s1] sm:$0xff]  ;;  %v955_v54 = vld [vmem:[%s1224_s0 + $0x1b8] sm:$0xff]   ;;  %v957_v56 = vld [vmem:[%s1224_s0 + $0x1f0] sm:$0xff]  }
   0xe   :  { %856 = vmatprep.subr.bf16.mxu1 %v932_v15  ;;  %v157_v41 = vcombine.high %v17_v40, %v17_v40  ;;  %v164_v42 = vrot.slane %v17_v40, %v1102_v37  ;;  %v958_v57 = vld [vmem:[%s1224_s0 + $0x130] sm:$0xff]   ;;  %v960_v59 = vld [vmem:[%s1224_s0 + $0x168] sm:$0xff]   ;;  %v964_v63 = vld [vmem:[%s1224_s0 + $0x160] sm:$0xff]  }
   0xf   :  { %v959_v60 = vld [vmem:[%s1224_s0 + $0x1b0] sm:$0xff]   ;;  %v961_v61 = vld [vmem:[%s1224_s0 + $0x1e8] sm:$0xff]   ;;  %v965_v1 = vld [vmem:[%s1224_s0 + $0x1e0] sm:$0xff]  }
  0x10   :  { %835 = vmatpush3.bf16.msra.mxu0 %v933_v16  ;;  %v172_v45 = vcombine.high %v164_v42, %v164_v42  ;;  %v180_v46 = vrot.slane %v164_v42, %v1102_v37  ;;  %v1122_v47 = vrot.slane %v157_v41, %v1102_v37  ;;  %v962_v62 = vld [vmem:[%s1224_s0 + $0x128] sm:$0xff]   ;;  %v966_v2 = vld [vmem:[%s1224_s0 + $0x120] sm:$0xff]   ;;  %v968_v3 = vld [vmem:[%s1224_s0 + $0x158] sm:$0xff]  }
  0x11   :  { %857 = vmatpush3.bf16.msra.mxu1 %v934_v17  ;;  %836 = vmatprep.subr.bf16.mxu0 %v935_v18  ;;  %v963_v0 = vld [vmem:[%s1224_s0 + $0x1a8] sm:$0xff]   ;;  %v967_v4 = vld [vmem:[%s1224_s0 + $0x1a0] sm:$0xff]   ;;  %v969_v5 = vld [vmem:[%s1224_s0 + $0x1d8] sm:$0xff]  }
  0x12   :  { %858 = vmatprep.subr.bf16.mxu1 %v936_v19  ;;  %v194_v48 = vrot.slane %v172_v45, %v1102_v37  ;;  %v173_v50 = vcombine.high %v1122_v47, %v1122_v47  ;;  %v202_v51 = vcombine.high %v180_v46, %v180_v46  ;;  %v970_v6 = vld [vmem:[%s1224_s0 + $0x118] sm:$0xff]   ;;  %v972_v7 = vld [vmem:[%s1224_s0 + $0x150] sm:$0xff]   ;;  %v976_v11 = vld [vmem:[%s1224_s0 + $0x148] sm:$0xff]  }
  0x13   :  { %v971_v8 = vld [vmem:[%s1224_s0 + $0x198] sm:$0xff]   ;;  %v973_v9 = vld [vmem:[%s1224_s0 + $0x1d0] sm:$0xff]   ;;  %v977_v13 = vld [vmem:[%s1224_s0 + $0x1c8] sm:$0xff]  }
  0x14   :  { %837 = vmatpush3.bf16.msra.mxu0 %v937_v20  ;;  %630 = vmatprep.mubr.bf16.mxu0 %v194_v48  ;;  %v204_v53 = vcombine.high %v194_v48, %v194_v48  ;;  %v201_v55 = vrot.slane %v173_v50, %v1102_v37  ;;  %v974_v10 = vld [vmem:[%s1224_s0 + $0x110] sm:$0xff]   ;;  %v978_v14 = vld [vmem:[%s1224_s0 + $0x108] sm:$0xff]   ;;  %v980_v15 = vld [vmem:[%s1224_s0 + $0x140] sm:$0xff]   ;;  %v187_v20 = vrot.slane %v1122_v47, %v1102_v37 }
  0x15   :  { %859 = vmatpush3.bf16.msra.mxu1 %v938_v21  ;;  %838 = vmatprep.subr.bf16.mxu0 %v939_v22  ;;  %v975_v12 = vld [vmem:[%s1224_s0 + $0x190] sm:$0xff]   ;;  %v979_v16 = vld [vmem:[%s1224_s0 + $0x188] sm:$0xff]   ;;  %v981_v17 = vld [vmem:[%s1224_s0 + $0x1c0] sm:$0xff]  }
  0x16   :  { %860 = vmatprep.subr.bf16.mxu1 %v940_v23  ;;  %670 = vmatprep.mubr.bf16.mxu1 %v204_v53  ;;  %v205_v58 = vcombine.high %v201_v55, %v201_v55  ;;  %v146_v18 = vld [vmem:[#allocation2] sm:$0x1]  ;;  %v203_v22 = vcombine.high %v187_v20, %v187_v20 }
  0x17   :  { %v982_v19 = vld [vmem:[%s1224_s0 + $0x100] sm:$0xff]   ;;  %149 = vperm.xlu0 %918, %v146_v18  }
  0x18   :  { %839 = vmatpush3.bf16.msra.mxu0 %v941_v27  ;;  %v983_v21 = vld [vmem:[%s1224_s0 + $0x180] sm:$0xff]  }
  0x19   :  { %861 = vmatpush3.bf16.msra.mxu1 %v942_v28  ;;  %840 = vmatprep.subr.bf16.mxu0 %v943_v29 }
  0x1a   :  { %862 = vmatprep.subr.bf16.mxu1 %v944_v30 }
  0x1c   :  { %841 = vmatpush3.bf16.msra.mxu0 %v945_v33 }
  0x1d   :  { %863 = vmatpush3.bf16.msra.mxu1 %v946_v34  ;;  %842 = vmatprep.subr.bf16.mxu0 %v947_v35 }
  0x1e   :  { %864 = vmatprep.subr.bf16.mxu1 %v948_v36 }
  0x20   :  { %843 = vmatpush3.bf16.msra.mxu0 %v949_v38 }
  0x21   :  { %865 = vmatpush3.bf16.msra.mxu1 %v950_v39  ;;  %872 = vmatprep.subr.bf16.mxu0 %v952_v43 }
  0x22   :  { %894 = vmatprep.subr.bf16.mxu1 %v953_v44 }
  0x23   :  { %631 = vmatmul.mubr.bf16.vlgmr.msra.gmra.mxu0 %v180_v46 }
  0x24   :  { %873 = vmatpush3.bf16.msra.mxu0 %v954_v49  ;;  %671 = vmatmul.mubr.bf16.vlgmr.msra.gmra.mxu1 %v202_v51 }
  0x25   :  { %874 = vmatprep.subr.bf16.mxu0 %v956_v52  ;;  %895 = vmatpush3.bf16.msra.mxu1 %v955_v54 }
  0x26   :  { %710 = vmatprep.mubr.bf16.mxu0 %v201_v55  ;;  %896 = vmatprep.subr.bf16.mxu1 %v957_v56 }
  0x27   :  { %750 = vmatprep.mubr.bf16.mxu1 %v205_v58 }
  0x28   :  { %875 = vmatpush3.bf16.msra.mxu0 %v958_v57 }
  0x29   :  { %876 = vmatprep.subr.bf16.mxu0 %v960_v59  ;;  %897 = vmatpush3.bf16.msra.mxu1 %v959_v60 }
  0x2a   :  { %898 = vmatprep.subr.bf16.mxu1 %v961_v61 }
  0x2c   :  { %877 = vmatpush3.bf16.msra.mxu0 %v962_v62 }
  0x2d   :  { %878 = vmatprep.subr.bf16.mxu0 %v964_v63  ;;  %899 = vmatpush3.bf16.msra.mxu1 %v963_v0 }
  0x2e   :  { %900 = vmatprep.subr.bf16.mxu1 %v965_v1 }
  0x30   :  { %879 = vmatpush3.bf16.msra.mxu0 %v966_v2 }
  0x31   :  { %880 = vmatprep.subr.bf16.mxu0 %v968_v3  ;;  %901 = vmatpush3.bf16.msra.mxu1 %v967_v4 }
  0x32   :  { %902 = vmatprep.subr.bf16.mxu1 %v969_v5 }
  0x34   :  { %881 = vmatpush3.bf16.msra.mxu0 %v970_v6 }
  0x35   :  { %882 = vmatprep.subr.bf16.mxu0 %v972_v7  ;;  %903 = vmatpush3.bf16.msra.mxu1 %v971_v8 }
  0x36   :  { %904 = vmatprep.subr.bf16.mxu1 %v973_v9 }
  0x38   :  { %883 = vmatpush3.bf16.msra.mxu0 %v974_v10 }
  0x39   :  { %884 = vmatprep.subr.bf16.mxu0 %v976_v11  ;;  %905 = vmatpush3.bf16.msra.mxu1 %v975_v12 }
  0x3a   :  { %906 = vmatprep.subr.bf16.mxu1 %v977_v13 }
  0x3c   :  { %885 = vmatpush3.bf16.msra.mxu0 %v978_v14 }
  0x3d   :  { %886 = vmatprep.subr.bf16.mxu0 %v980_v15  ;;  %907 = vmatpush3.bf16.msra.mxu1 %v979_v16 }
  0x3e   :  { %908 = vmatprep.subr.bf16.mxu1 %v981_v17 }
  0x40   :  { %887 = vmatpush3.bf16.msra.mxu0 %v982_v19 }
  0x41   :  { %909 = vmatpush3.bf16.msra.mxu1 %v983_v21 }
  0x43   :  { %711 = vmatmul.mubr.bf16.vlgmr.msra.gmra.mxu0 %v187_v20 }
  0x44   :  { %751 = vmatmul.mubr.bf16.vlgmr.msra.gmra.mxu1 %v203_v22 }
  0x92   :  { %v150_v33 = vpop.permute.xlu0 %149 }
  0x93   :  { %v155_v34 = vrot.slane %v150_v33, %v154_v32 }
  0xe3   :  { %v844_v23 = vpop.f32.mrf.mxu0 }
  0xe4   :  { %v866_v24 = vpop.f32.mrf.mxu1 }
  0xe5   :  { %v845_v25 = vpop.f32.mrf.mxu0 }
  0xe6   :  { %v867_v26 = vpop.f32.mrf.mxu1  ;;  %v846_v35 = vadd.f32 %v845_v25, %v844_v23 }
  0xe7   :  { %v847_v27 = vpop.f32.mrf.mxu0  ;;  %v868_v37 = vadd.f32 %v867_v26, %v866_v24 }
  0xe8   :  { %v869_v28 = vpop.f32.mrf.mxu1  ;;  %v633_v36 = vadd.f32 %v846_v35, %v155_v34 }
  0xe9   :  { %v848_v29 = vpop.f32.mrf.mxu0 }
  0xea   :  { %v870_v30 = vpop.f32.mrf.mxu1  ;;  %v673_v41 = vadd.f32 %v868_v37, %v633_v36 }
 0x103   :  { %v888_v38 = vpop.f32.mrf.mxu0 }
 0x104   :  { %v910_v39 = vpop.f32.mrf.mxu1 }
 0x105   :  { %v889_v40 = vpop.f32.mrf.mxu0 }
 0x106   :  { %v890_v42 = vadd.f32 %v889_v40, %v888_v38  ;;  %v911_v43 = vpop.f32.mrf.mxu1 }
 0x107   :  { %v891_v44 = vpop.f32.mrf.mxu0  ;;  %v912_v46 = vadd.f32 %v911_v43, %v910_v39 }
 0x108   :  { %v713_v45 = vadd.f32 %v890_v42, %v673_v41  ;;  %v913_v47 = vpop.f32.mrf.mxu1 }
 0x109   :  { %v892_v48 = vpop.f32.mrf.mxu0 }
 0x10a   :  { %v753_v49 = vadd.f32 %v912_v46, %v713_v45  ;;  %v914_v50 = vpop.f32.mrf.mxu1 }
 0x10c   :  { %759 = vst.msk [vmem:[%s1227_s3] sm:$0x1] %vm758_vm0, %v753_v49 }

</bundles_post_ra>
